<compile_context>
chip_gen: v5e
topology: v5e:2x2
jax: 0.10.0
libtpu: 0.0.40
codegen_flags: <defaults>
</compile_context>

<pallas_src>
import functools

import jax
import jax.numpy as jnp
from jax.experimental import pallas as pl
from jax.experimental.pallas import tpu as pltpu

BN_EPS = 1e-5


def _round_up(v, m):
    return (v + m - 1) // m * m


# --------------------------------------------------------------------------
# in-kernel helpers
# --------------------------------------------------------------------------
def _dilated_conv_matmul(x_f32, w_kc, H, W, *, dil=2, k_pad=0):
    """3x3 / stride 1 / dilation=dil / pad=dil conv of ONE image, lane-dense.

    x_f32 : (C, H*W)            f32 activations (channels on sublanes, H*W on lanes)
    w_kc  : (Cout, 9*C + k_pad) bf16 tap-major weights, K ordered (ky, kx, c);
                                trailing k_pad rows are zero.
    returns (Cout, H*W) f32 raw conv output (lane-dense).
    """
    C, L = x_f32.shape
    lin = jax.lax.broadcasted_iota(jnp.int32, (C, L), 1)      # flattened position
    w_pos = lin % W                                            # column within row
    taps = []
    for ky in range(3):
        for kx in range(3):
            dy = dil * (ky - 1)
            dx = dil * (kx - 1)
            # source pixel of this tap sits src_off lanes away in flat coords
            src_off = dy * W + dx
            shift = (-src_off) % L
            t = x_f32 if shift == 0 else pltpu.roll(x_f32, shift, 1)
            # zero-padding boundary mask; lane-wrapped values are always
            # out of bounds, so the same mask kills them too
            valid = ((lin >= max(0, -dy) * W) &
                     (lin < (H - max(0, dy)) * W) &
                     (w_pos >= max(0, -dx)) &
                     (w_pos < W - max(0, dx)))
            taps.append(jnp.where(valid, t, 0.0).astype(jnp.bfloat16))
    if k_pad:
        taps.append(jnp.zeros((k_pad, L), jnp.bfloat16))
    col = jnp.concatenate(taps, axis=0)                        # (9C+k_pad, L) bf16
    return jnp.dot(w_kc, col, preferred_element_type=jnp.float32)


def _store_stats(stats_ref, acc):
    """Lane-dense per-step BN partial stats: lane 0 = sum, lane 1 = sum(x^2)."""
    s = jnp.sum(acc, axis=1, keepdims=True)
    sq = jnp.sum(acc * acc, axis=1, keepdims=True)
    lane = jax.lax.broadcasted_iota(jnp.int32, stats_ref.shape, 1)
    stats_ref[...] = jnp.where(lane == 0, s, jnp.where(lane == 1, sq, 0.0))


# --------------------------------------------------------------------------
# kernels (grid = (N,), one image per grid step, "parallel")
# --------------------------------------------------------------------------
def _conv1_kernel(x_ref, w_ref, a_ref, stats_ref, *, H, W, k_pad):
    # x_ref: (Cin, H*W) f32   w_ref: (Cout, K1p) bf16
    acc = _dilated_conv_matmul(x_ref[...], w_ref[...], H, W, k_pad=k_pad)
    a_ref[...] = acc.astype(a_ref.dtype)        # bf16 intermediate (pre-BN conv1)
    _store_stats(stats_ref, acc)                # from the f32 accumulator


def _bn_relu_conv2_kernel(a_ref, s_ref, t_ref, w_ref, o_ref, stats_ref, *, H, W, k_pad):
    # a_ref: (Cout, H*W) bf16 raw conv1;  s/t: (Cout, 1) fused BN1 scale/shift (f32)
    y = jnp.maximum(a_ref[...].astype(jnp.float32) * s_ref[...] + t_ref[...], 0.0)
    acc = _dilated_conv_matmul(y, w_ref[...], H, W, k_pad=k_pad)
    o_ref[...] = acc.astype(o_ref.dtype)        # bf16 intermediate (pre-BN conv2)
    _store_stats(stats_ref, acc)


# --------------------------------------------------------------------------
# host-side glue
# --------------------------------------------------------------------------
def _bn_scale_shift(stats, n_per_step, gamma, beta):
    """Global train-mode BN -> per-channel f32 scale/shift.

    stats: (steps, C, 128) f32, lane 0 = per-step sum, lane 1 = per-step sum(x^2).
    Per-step moments are combined with Chan's parallel-variance formula
    (biased variance, as PyTorch uses for normalization in training mode)."""
    sums = stats[:, :, 0]                                      # (steps, C)
    sqs = stats[:, :, 1]
    steps = stats.shape[0]
    total = steps * n_per_step
    mean_i = sums / n_per_step
    m2_i = sqs - sums * mean_i                                 # per-step sum((x-mean_i)^2)
    mean = jnp.sum(sums, axis=0) / total
    m2 = jnp.sum(m2_i, axis=0) + n_per_step * jnp.sum((mean_i - mean) ** 2, axis=0)
    var = jnp.maximum(m2 / total, 0.0)
    scale = gamma * jax.lax.rsqrt(var + BN_EPS)
    shift = beta - mean * scale
    return (scale.reshape(-1, 1).astype(jnp.float32),
            shift.reshape(-1, 1).astype(jnp.float32))


def double_conv(x, w1, g1, b1, w2, g2, b2):
    """x: (N, Cin, H, W) f32 NCHW.  w1: (Cout, Cin, 3, 3), w2: (Cout, Cout, 3, 3) OIHW."""
    N, Cin, H, W = x.shape
    Cout = w1.shape[0]
    HW = H * W

    # lane-dense view of the input: free reshape, no transpose
    x2d = x.reshape(N, Cin, HW)

    # pack conv weights as dense tap-major bf16 matmul operands; K padded to a
    # multiple of 16 (bf16 sublane pack).  K index = (ky*3 + kx)*C + c, matching
    # the in-kernel tap ordering.
    K1, K2 = 9 * Cin, 9 * Cout
    K1p, K2p = _round_up(K1, 16), _round_up(K2, 16)
    w1m = jnp.pad(jnp.transpose(w1, (0, 2, 3, 1)).reshape(Cout, K1),
                  ((0, 0), (0, K1p - K1))).astype(jnp.bfloat16)
    w2m = jnp.pad(jnp.transpose(w2, (0, 2, 3, 1)).reshape(Cout, K2),
                  ((0, 0), (0, K2p - K2))).astype(jnp.bfloat16)

    cparams = pltpu.CompilerParams(dimension_semantics=("parallel",),
                                   vmem_limit_bytes=32 * 1024 * 1024)

    # ---- pass 1: conv1 (raw, bf16) + lane-dense BN1 partial stats ------------
    a1, st1 = pl.pallas_call(
        functools.partial(_conv1_kernel, H=H, W=W, k_pad=K1p - K1),
        grid=(N,),
        in_specs=[pl.BlockSpec((None, Cin, HW), lambda n: (n, 0, 0)),
                  pl.BlockSpec((Cout, K1p), lambda n: (0, 0))],
        out_specs=[pl.BlockSpec((None, Cout, HW), lambda n: (n, 0, 0)),
                   pl.BlockSpec((None, Cout, 128), lambda n: (n, 0, 0))],
        out_shape=(jax.ShapeDtypeStruct((N, Cout, HW), jnp.bfloat16),
                   jax.ShapeDtypeStruct((N, Cout, 128), jnp.float32)),
        compiler_params=cparams,
    )(x2d, w1m)
    s1, t1 = _bn_scale_shift(st1, HW, g1, b1)

    # ---- pass 2: BN1+ReLU -> conv2 (raw, bf16) + lane-dense BN2 stats --------
    a2, st2 = pl.pallas_call(
        functools.partial(_bn_relu_conv2_kernel, H=H, W=W, k_pad=K2p - K2),
        grid=(N,),
        in_specs=[pl.BlockSpec((None, Cout, HW), lambda n: (n, 0, 0)),
                  pl.BlockSpec((Cout, 1), lambda n: (0, 0)),
                  pl.BlockSpec((Cout, 1), lambda n: (0, 0)),
                  pl.BlockSpec((Cout, K2p), lambda n: (0, 0))],
        out_specs=[pl.BlockSpec((None, Cout, HW), lambda n: (n, 0, 0)),
                   pl.BlockSpec((None, Cout, 128), lambda n: (n, 0, 0))],
        out_shape=(jax.ShapeDtypeStruct((N, Cout, HW), jnp.bfloat16),
                   jax.ShapeDtypeStruct((N, Cout, 128), jnp.float32)),
        compiler_params=cparams,
    )(a1, s1, t1, w2m)
    s2, t2 = _bn_scale_shift(st2, HW, g2, b2)

    # ---- BN2 + ReLU: trivial elementwise epilogue, left to XLA (fuses with
    #      the free reshape back to NCHW) --------------------------------------
    out = jnp.maximum(a2.astype(jnp.float32) * s2.reshape(1, Cout, 1)
                      + t2.reshape(1, Cout, 1), 0.0)
    return out.reshape(N, Cout, H, W)


# --------------------------------------------------------------------------
# parameter init matching the nn.Module (Conv2d bias=False, BN gamma=1 beta=0)
# --------------------------------------------------------------------------
def init_params(key, in_channels, out_channels):
    k1, k2 = jax.random.split(key)
    bound1 = 1.0 / jnp.sqrt(in_channels * 9.0)
    bound2 = 1.0 / jnp.sqrt(out_channels * 9.0)
    w1 = jax.random.uniform(k1, (out_channels, in_channels, 3, 3),
                            jnp.float32, -bound1, bound1)
    w2 = jax.random.uniform(k2, (out_channels, out_channels, 3, 3),
                            jnp.float32, -bound2, bound2)
    g1 = jnp.ones((out_channels,), jnp.float32)
    b1 = jnp.zeros((out_channels,), jnp.float32)
    g2 = jnp.ones((out_channels,), jnp.float32)
    b2 = jnp.zeros((out_channels,), jnp.float32)
    return w1, g1, b1, w2, g2, b2


# --------------------------------------------------------------------------
# pure-JAX f32 reference (PyTorch train-mode forward semantics)
# --------------------------------------------------------------------------
def double_conv_ref(x, w1, g1, b1, w2, g2, b2):
    def conv(v, w):
        return jax.lax.conv_general_dilated(
            v, w, window_strides=(1, 1), padding=((2, 2), (2, 2)),
            rhs_dilation=(2, 2), dimension_numbers=("NCHW", "OIHW", "NCHW"))

    def bn_relu(v, g, b):
        mean = jnp.mean(v, axis=(0, 2, 3), keepdims=True)
        var = jnp.mean((v - mean) ** 2, axis=(0, 2, 3), keepdims=True)
        y = (v - mean) * jax.lax.rsqrt(var + BN_EPS)
        y = y * g.reshape(1, -1, 1, 1) + b.reshape(1, -1, 1, 1)
        return jnp.maximum(y, 0.0)

    return bn_relu(conv(bn_relu(conv(x, w1), g1, b1), w2), g2, b2)


if __name__ == "__main__":
    key = jax.random.PRNGKey(0)
    kx, kp = jax.random.split(key)

    N, Cin, Cout, H, W = 2, 4, 8, 16, 16
    x = jax.random.normal(kx, (N, Cin, H, W), jnp.float32)
    params = init_params(kp, Cin, Cout)

    out = jax.block_until_ready(jax.jit(double_conv)(x, *params))

    assert out.shape == (N, Cout, H, W), out.shape
    assert bool(jnp.all(jnp.isfinite(out)))

    # bf16 matmul operands + bf16 stored intermediates (f32 accumulation/stats)
    # -> small deviation vs the f32 reference
    ref = double_conv_ref(x, *params)
    err = float(jnp.max(jnp.abs(out - ref)))
    assert err < 1e-1, f"max abs error vs f32 reference too large: {err}"

    print("KERNEL_OK")
</pallas_src>

<mosaic_0001>
module attributes {stable_mosaic.version = 11 : i64} {
  func.func @_conv1_kernel(%arg0: i32, %arg1: memref<1x4x256xf32, #tpu.memory_space<vmem>>, %arg2: memref<8x48xbf16, #tpu.memory_space<vmem>>, %arg3: memref<1x8x256xbf16, #tpu.memory_space<vmem>>, %arg4: memref<1x8x128xf32, #tpu.memory_space<vmem>>) attributes {dimension_semantics = [#tpu.dimension_semantics<parallel>], iteration_bounds = array<i64: 2>, scalar_prefetch = 0 : i64, scratch_operands = 0 : i64, tpu.core_type = #tpu.core_type<tc>, window_params = [{transform_indices = @transform_0, window_bounds = array<i64: 1, 4, 256>}, {pipeline_mode = #tpu.pipeline_mode<synchronous>, transform_indices = @transform_1, window_bounds = array<i64: 8, 48>}, {transform_indices = @transform_2, window_bounds = array<i64: 1, 8, 256>}, {transform_indices = @transform_3, window_bounds = array<i64: 1, 8, 128>}]} {
    %c0 = arith.constant 0 : index
    %c0_0 = arith.constant 0 : index
    %c0_1 = arith.constant 0 : index
    %0 = vector.load %arg1[%c0, %c0_0, %c0_1] : memref<1x4x256xf32, #tpu.memory_space<vmem>>, vector<1x4x256xf32>
    %1 = vector.shape_cast %0 : vector<1x4x256xf32> to vector<4x256xf32>
    %c0_2 = arith.constant 0 : index
    %c0_3 = arith.constant 0 : index
    %2 = vector.load %arg2[%c0_2, %c0_3] : memref<8x48xbf16, #tpu.memory_space<vmem>>, vector<8x48xbf16>
    %3 = tpu.iota {dimensions = array<i32: 1>} : vector<4x256xi32>
    %c16_i32 = arith.constant 16 : i32
    %c0_i32 = arith.constant 0 : i32
    %4 = arith.cmpi eq, %c16_i32, %c0_i32 : i32
    %c1_i32 = arith.constant 1 : i32
    %5 = arith.select %4, %c1_i32, %c16_i32 : i32
    %6 = vector.broadcast %5 : i32 to vector<4x256xi32>
    %7 = arith.remsi %3, %6 : vector<4x256xi32>
    %c0_i32_4 = arith.constant 0 : i32
    %8 = vector.broadcast %c0_i32_4 : i32 to vector<4x256xi32>
    %9 = arith.cmpi ne, %7, %8 : vector<4x256xi32>
    %c0_i32_5 = arith.constant 0 : i32
    %10 = vector.broadcast %c0_i32_5 : i32 to vector<4x256xi32>
    %11 = arith.cmpi slt, %7, %10 : vector<4x256xi32>
    %c0_i32_6 = arith.constant 0 : i32
    %12 = arith.cmpi slt, %5, %c0_i32_6 : i32
    %13 = vector.broadcast %12 : i1 to vector<4x256xi1>
    %14 = vector.broadcast %13 : vector<4x256xi1> to vector<4x256xi1>
    %15 = arith.xori %11, %14 : vector<4x256xi1>
    %16 = arith.andi %15, %9 : vector<4x256xi1>
    %17 = vector.broadcast %5 : i32 to vector<4x256xi32>
    %18 = arith.addi %7, %17 : vector<4x256xi32>
    %19 = arith.select %16, %18, %7 : vector<4x256xi1>, vector<4x256xi32>
    %c34_i32 = arith.constant 34 : i32
    %20 = tpu.dynamic_rotate %1 by %c34_i32 dim 1 : vector<4x256xf32>, i32 -> vector<4x256xf32>
    %c32_i32 = arith.constant 32 : i32
    %21 = vector.broadcast %c32_i32 : i32 to vector<4x256xi32>
    %22 = arith.cmpi sge, %3, %21 : vector<4x256xi32>
    %c256_i32 = arith.constant 256 : i32
    %23 = vector.broadcast %c256_i32 : i32 to vector<4x256xi32>
    %24 = arith.cmpi slt, %3, %23 : vector<4x256xi32>
    %25 = arith.andi %22, %24 : vector<4x256xi1>
    %c2_i32 = arith.constant 2 : i32
    %26 = vector.broadcast %c2_i32 : i32 to vector<4x256xi32>
    %27 = arith.cmpi sge, %19, %26 : vector<4x256xi32>
    %28 = arith.andi %25, %27 : vector<4x256xi1>
    %c16_i32_7 = arith.constant 16 : i32
    %29 = vector.broadcast %c16_i32_7 : i32 to vector<4x256xi32>
    %30 = arith.cmpi slt, %19, %29 : vector<4x256xi32>
    %31 = arith.andi %28, %30 : vector<4x256xi1>
    %cst = arith.constant 0.000000e+00 : f32
    %32 = vector.broadcast %cst : f32 to vector<4x256xf32>
    %33 = arith.select %31, %20, %32 : vector<4x256xi1>, vector<4x256xf32>
    %34 = arith.truncf %33 : vector<4x256xf32> to vector<4x256xbf16>
    %c32_i32_8 = arith.constant 32 : i32
    %35 = tpu.dynamic_rotate %1 by %c32_i32_8 dim 1 : vector<4x256xf32>, i32 -> vector<4x256xf32>
    %c32_i32_9 = arith.constant 32 : i32
    %36 = vector.broadcast %c32_i32_9 : i32 to vector<4x256xi32>
    %37 = arith.cmpi sge, %3, %36 : vector<4x256xi32>
    %c256_i32_10 = arith.constant 256 : i32
    %38 = vector.broadcast %c256_i32_10 : i32 to vector<4x256xi32>
    %39 = arith.cmpi slt, %3, %38 : vector<4x256xi32>
    %40 = arith.andi %37, %39 : vector<4x256xi1>
    %c0_i32_11 = arith.constant 0 : i32
    %41 = vector.broadcast %c0_i32_11 : i32 to vector<4x256xi32>
    %42 = arith.cmpi sge, %19, %41 : vector<4x256xi32>
    %43 = arith.andi %40, %42 : vector<4x256xi1>
    %c16_i32_12 = arith.constant 16 : i32
    %44 = vector.broadcast %c16_i32_12 : i32 to vector<4x256xi32>
    %45 = arith.cmpi slt, %19, %44 : vector<4x256xi32>
    %46 = arith.andi %43, %45 : vector<4x256xi1>
    %cst_13 = arith.constant 0.000000e+00 : f32
    %47 = vector.broadcast %cst_13 : f32 to vector<4x256xf32>
    %48 = arith.select %46, %35, %47 : vector<4x256xi1>, vector<4x256xf32>
    %49 = arith.truncf %48 : vector<4x256xf32> to vector<4x256xbf16>
    %c30_i32 = arith.constant 30 : i32
    %50 = tpu.dynamic_rotate %1 by %c30_i32 dim 1 : vector<4x256xf32>, i32 -> vector<4x256xf32>
    %c32_i32_14 = arith.constant 32 : i32
    %51 = vector.broadcast %c32_i32_14 : i32 to vector<4x256xi32>
    %52 = arith.cmpi sge, %3, %51 : vector<4x256xi32>
    %c256_i32_15 = arith.constant 256 : i32
    %53 = vector.broadcast %c256_i32_15 : i32 to vector<4x256xi32>
    %54 = arith.cmpi slt, %3, %53 : vector<4x256xi32>
    %55 = arith.andi %52, %54 : vector<4x256xi1>
    %c0_i32_16 = arith.constant 0 : i32
    %56 = vector.broadcast %c0_i32_16 : i32 to vector<4x256xi32>
    %57 = arith.cmpi sge, %19, %56 : vector<4x256xi32>
    %58 = arith.andi %55, %57 : vector<4x256xi1>
    %c14_i32 = arith.constant 14 : i32
    %59 = vector.broadcast %c14_i32 : i32 to vector<4x256xi32>
    %60 = arith.cmpi slt, %19, %59 : vector<4x256xi32>
    %61 = arith.andi %58, %60 : vector<4x256xi1>
    %cst_17 = arith.constant 0.000000e+00 : f32
    %62 = vector.broadcast %cst_17 : f32 to vector<4x256xf32>
    %63 = arith.select %61, %50, %62 : vector<4x256xi1>, vector<4x256xf32>
    %64 = arith.truncf %63 : vector<4x256xf32> to vector<4x256xbf16>
    %c2_i32_18 = arith.constant 2 : i32
    %65 = tpu.dynamic_rotate %1 by %c2_i32_18 dim 1 : vector<4x256xf32>, i32 -> vector<4x256xf32>
    %c0_i32_19 = arith.constant 0 : i32
    %66 = vector.broadcast %c0_i32_19 : i32 to vector<4x256xi32>
    %67 = arith.cmpi sge, %3, %66 : vector<4x256xi32>
    %c256_i32_20 = arith.constant 256 : i32
    %68 = vector.broadcast %c256_i32_20 : i32 to vector<4x256xi32>
    %69 = arith.cmpi slt, %3, %68 : vector<4x256xi32>
    %70 = arith.andi %67, %69 : vector<4x256xi1>
    %c2_i32_21 = arith.constant 2 : i32
    %71 = vector.broadcast %c2_i32_21 : i32 to vector<4x256xi32>
    %72 = arith.cmpi sge, %19, %71 : vector<4x256xi32>
    %73 = arith.andi %70, %72 : vector<4x256xi1>
    %c16_i32_22 = arith.constant 16 : i32
    %74 = vector.broadcast %c16_i32_22 : i32 to vector<4x256xi32>
    %75 = arith.cmpi slt, %19, %74 : vector<4x256xi32>
    %76 = arith.andi %73, %75 : vector<4x256xi1>
    %cst_23 = arith.constant 0.000000e+00 : f32
    %77 = vector.broadcast %cst_23 : f32 to vector<4x256xf32>
    %78 = arith.select %76, %65, %77 : vector<4x256xi1>, vector<4x256xf32>
    %79 = arith.truncf %78 : vector<4x256xf32> to vector<4x256xbf16>
    %c0_i32_24 = arith.constant 0 : i32
    %80 = vector.broadcast %c0_i32_24 : i32 to vector<4x256xi32>
    %81 = arith.cmpi sge, %3, %80 : vector<4x256xi32>
    %c256_i32_25 = arith.constant 256 : i32
    %82 = vector.broadcast %c256_i32_25 : i32 to vector<4x256xi32>
    %83 = arith.cmpi slt, %3, %82 : vector<4x256xi32>
    %84 = arith.andi %81, %83 : vector<4x256xi1>
    %c0_i32_26 = arith.constant 0 : i32
    %85 = vector.broadcast %c0_i32_26 : i32 to vector<4x256xi32>
    %86 = arith.cmpi sge, %19, %85 : vector<4x256xi32>
    %87 = arith.andi %84, %86 : vector<4x256xi1>
    %c16_i32_27 = arith.constant 16 : i32
    %88 = vector.broadcast %c16_i32_27 : i32 to vector<4x256xi32>
    %89 = arith.cmpi slt, %19, %88 : vector<4x256xi32>
    %90 = arith.andi %87, %89 : vector<4x256xi1>
    %cst_28 = arith.constant 0.000000e+00 : f32
    %91 = vector.broadcast %cst_28 : f32 to vector<4x256xf32>
    %92 = arith.select %90, %1, %91 : vector<4x256xi1>, vector<4x256xf32>
    %93 = arith.truncf %92 : vector<4x256xf32> to vector<4x256xbf16>
    %c254_i32 = arith.constant 254 : i32
    %94 = tpu.dynamic_rotate %1 by %c254_i32 dim 1 : vector<4x256xf32>, i32 -> vector<4x256xf32>
    %c0_i32_29 = arith.constant 0 : i32
    %95 = vector.broadcast %c0_i32_29 : i32 to vector<4x256xi32>
    %96 = arith.cmpi sge, %3, %95 : vector<4x256xi32>
    %c256_i32_30 = arith.constant 256 : i32
    %97 = vector.broadcast %c256_i32_30 : i32 to vector<4x256xi32>
    %98 = arith.cmpi slt, %3, %97 : vector<4x256xi32>
    %99 = arith.andi %96, %98 : vector<4x256xi1>
    %c0_i32_31 = arith.constant 0 : i32
    %100 = vector.broadcast %c0_i32_31 : i32 to vector<4x256xi32>
    %101 = arith.cmpi sge, %19, %100 : vector<4x256xi32>
    %102 = arith.andi %99, %101 : vector<4x256xi1>
    %c14_i32_32 = arith.constant 14 : i32
    %103 = vector.broadcast %c14_i32_32 : i32 to vector<4x256xi32>
    %104 = arith.cmpi slt, %19, %103 : vector<4x256xi32>
    %105 = arith.andi %102, %104 : vector<4x256xi1>
    %cst_33 = arith.constant 0.000000e+00 : f32
    %106 = vector.broadcast %cst_33 : f32 to vector<4x256xf32>
    %107 = arith.select %105, %94, %106 : vector<4x256xi1>, vector<4x256xf32>
    %108 = arith.truncf %107 : vector<4x256xf32> to vector<4x256xbf16>
    %c226_i32 = arith.constant 226 : i32
    %109 = tpu.dynamic_rotate %1 by %c226_i32 dim 1 : vector<4x256xf32>, i32 -> vector<4x256xf32>
    %c0_i32_34 = arith.constant 0 : i32
    %110 = vector.broadcast %c0_i32_34 : i32 to vector<4x256xi32>
    %111 = arith.cmpi sge, %3, %110 : vector<4x256xi32>
    %c224_i32 = arith.constant 224 : i32
    %112 = vector.broadcast %c224_i32 : i32 to vector<4x256xi32>
    %113 = arith.cmpi slt, %3, %112 : vector<4x256xi32>
    %114 = arith.andi %111, %113 : vector<4x256xi1>
    %c2_i32_35 = arith.constant 2 : i32
    %115 = vector.broadcast %c2_i32_35 : i32 to vector<4x256xi32>
    %116 = arith.cmpi sge, %19, %115 : vector<4x256xi32>
    %117 = arith.andi %114, %116 : vector<4x256xi1>
    %c16_i32_36 = arith.constant 16 : i32
    %118 = vector.broadcast %c16_i32_36 : i32 to vector<4x256xi32>
    %119 = arith.cmpi slt, %19, %118 : vector<4x256xi32>
    %120 = arith.andi %117, %119 : vector<4x256xi1>
    %cst_37 = arith.constant 0.000000e+00 : f32
    %121 = vector.broadcast %cst_37 : f32 to vector<4x256xf32>
    %122 = arith.select %120, %109, %121 : vector<4x256xi1>, vector<4x256xf32>
    %123 = arith.truncf %122 : vector<4x256xf32> to vector<4x256xbf16>
    %c224_i32_38 = arith.constant 224 : i32
    %124 = tpu.dynamic_rotate %1 by %c224_i32_38 dim 1 : vector<4x256xf32>, i32 -> vector<4x256xf32>
    %c0_i32_39 = arith.constant 0 : i32
    %125 = vector.broadcast %c0_i32_39 : i32 to vector<4x256xi32>
    %126 = arith.cmpi sge, %3, %125 : vector<4x256xi32>
    %c224_i32_40 = arith.constant 224 : i32
    %127 = vector.broadcast %c224_i32_40 : i32 to vector<4x256xi32>
    %128 = arith.cmpi slt, %3, %127 : vector<4x256xi32>
    %129 = arith.andi %126, %128 : vector<4x256xi1>
    %c0_i32_41 = arith.constant 0 : i32
    %130 = vector.broadcast %c0_i32_41 : i32 to vector<4x256xi32>
    %131 = arith.cmpi sge, %19, %130 : vector<4x256xi32>
    %132 = arith.andi %129, %131 : vector<4x256xi1>
    %c16_i32_42 = arith.constant 16 : i32
    %133 = vector.broadcast %c16_i32_42 : i32 to vector<4x256xi32>
    %134 = arith.cmpi slt, %19, %133 : vector<4x256xi32>
    %135 = arith.andi %132, %134 : vector<4x256xi1>
    %cst_43 = arith.constant 0.000000e+00 : f32
    %136 = vector.broadcast %cst_43 : f32 to vector<4x256xf32>
    %137 = arith.select %135, %124, %136 : vector<4x256xi1>, vector<4x256xf32>
    %138 = arith.truncf %137 : vector<4x256xf32> to vector<4x256xbf16>
    %c222_i32 = arith.constant 222 : i32
    %139 = tpu.dynamic_rotate %1 by %c222_i32 dim 1 : vector<4x256xf32>, i32 -> vector<4x256xf32>
    %c0_i32_44 = arith.constant 0 : i32
    %140 = vector.broadcast %c0_i32_44 : i32 to vector<4x256xi32>
    %141 = arith.cmpi sge, %3, %140 : vector<4x256xi32>
    %c224_i32_45 = arith.constant 224 : i32
    %142 = vector.broadcast %c224_i32_45 : i32 to vector<4x256xi32>
    %143 = arith.cmpi slt, %3, %142 : vector<4x256xi32>
    %144 = arith.andi %141, %143 : vector<4x256xi1>
    %c0_i32_46 = arith.constant 0 : i32
    %145 = vector.broadcast %c0_i32_46 : i32 to vector<4x256xi32>
    %146 = arith.cmpi sge, %19, %145 : vector<4x256xi32>
    %147 = arith.andi %144, %146 : vector<4x256xi1>
    %c14_i32_47 = arith.constant 14 : i32
    %148 = vector.broadcast %c14_i32_47 : i32 to vector<4x256xi32>
    %149 = arith.cmpi slt, %19, %148 : vector<4x256xi32>
    %150 = arith.andi %147, %149 : vector<4x256xi1>
    %cst_48 = arith.constant 0.000000e+00 : f32
    %151 = vector.broadcast %cst_48 : f32 to vector<4x256xf32>
    %152 = arith.select %150, %139, %151 : vector<4x256xi1>, vector<4x256xf32>
    %153 = arith.truncf %152 : vector<4x256xf32> to vector<4x256xbf16>
    %cst_49 = arith.constant 0.000000e+00 : bf16
    %154 = vector.broadcast %cst_49 : bf16 to vector<12x256xbf16>
    %155 = tpu.concatenate %34, %49, %64, %79, %93, %108, %123, %138, %153, %154 in 0 : vector<4x256xbf16>, vector<4x256xbf16>, vector<4x256xbf16>, vector<4x256xbf16>, vector<4x256xbf16>, vector<4x256xbf16>, vector<4x256xbf16>, vector<4x256xbf16>, vector<4x256xbf16>, vector<12x256xbf16> -> vector<48x256xbf16>
    %cst_50 = arith.constant dense<0.000000e+00> : vector<8x256xf32>
    %156 = tpu.matmul %2, %155, %cst_50 {dimension_numbers = #tpu.dot_dimension_numbers<[1], [0], [0], [1], [0, 0, 1, 1], [], []>} : vector<8x48xbf16>, vector<48x256xbf16>, vector<8x256xf32> -> vector<8x256xf32>
    %157 = arith.truncf %156 : vector<8x256xf32> to vector<8x256xbf16>
    %c0_51 = arith.constant 0 : index
    %c0_52 = arith.constant 0 : index
    %c0_53 = arith.constant 0 : index
    %158 = vector.load %arg3[%c0_51, %c0_52, %c0_53] : memref<1x8x256xbf16, #tpu.memory_space<vmem>>, vector<1x8x256xbf16>
    %159 = vector.shape_cast %158 : vector<1x8x256xbf16> to vector<8x256xbf16>
    %160 = vector.shape_cast %157 : vector<8x256xbf16> to vector<1x8x256xbf16>
    tpu.vector_store %arg3[%c0_51, %c0_52, %c0_53], %160 {strides = array<i32>} : memref<1x8x256xbf16, #tpu.memory_space<vmem>>, vector<1x8x256xbf16>,
    %cst_54 = arith.constant dense<0.000000e+00> : vector<8xf32>
    %161 = vector.multi_reduction <add>, %156, %cst_54 [1] : vector<8x256xf32> to vector<8xf32>
    %162 = vector.shape_cast %161 : vector<8xf32> to vector<8x1xf32>
    %163 = arith.mulf %156, %156 : vector<8x256xf32>
    %cst_55 = arith.constant dense<0.000000e+00> : vector<8xf32>
    %164 = vector.multi_reduction <add>, %163, %cst_55 [1] : vector<8x256xf32> to vector<8xf32>
    %165 = vector.shape_cast %164 : vector<8xf32> to vector<8x1xf32>
    %166 = tpu.iota {dimensions = array<i32: 1>} : vector<8x128xi32>
    %c0_i32_56 = arith.constant 0 : i32
    %167 = vector.broadcast %c0_i32_56 : i32 to vector<8x128xi32>
    %168 = arith.cmpi eq, %166, %167 : vector<8x128xi32>
    %c1_i32_57 = arith.constant 1 : i32
    %169 = vector.broadcast %c1_i32_57 : i32 to vector<8x128xi32>
    %170 = arith.cmpi eq, %166, %169 : vector<8x128xi32>
    %cst_58 = arith.constant 0.000000e+00 : f32
    %171 = vector.shape_cast %165 : vector<8x1xf32> to vector<8x1xf32>
    %172 = vector.broadcast %171 : vector<8x1xf32> to vector<8x128xf32>
    %173 = vector.broadcast %cst_58 : f32 to vector<8x128xf32>
    %174 = arith.select %170, %172, %173 : vector<8x128xi1>, vector<8x128xf32>
    %175 = vector.shape_cast %162 : vector<8x1xf32> to vector<8x1xf32>
    %176 = vector.broadcast %175 : vector<8x1xf32> to vector<8x128xf32>
    %177 = arith.select %168, %176, %174 : vector<8x128xi1>, vector<8x128xf32>
    %c0_59 = arith.constant 0 : index
    %c0_60 = arith.constant 0 : index
    %c0_61 = arith.constant 0 : index
    %178 = vector.load %arg4[%c0_59, %c0_60, %c0_61] : memref<1x8x128xf32, #tpu.memory_space<vmem>>, vector<1x8x128xf32>
    %179 = vector.shape_cast %178 : vector<1x8x128xf32> to vector<8x128xf32>
    %180 = vector.shape_cast %177 : vector<8x128xf32> to vector<1x8x128xf32>
    tpu.vector_store %arg4[%c0_59, %c0_60, %c0_61], %180 {strides = array<i32>} : memref<1x8x128xf32, #tpu.memory_space<vmem>>, vector<1x8x128xf32>,
    return
  }
  func.func @transform_0(%arg0: i32) -> (i32, i32, i32) {
    %c0_i32 = arith.constant 0 : i32
    %c0_i32_0 = arith.constant 0 : i32
    %c0_i32_1 = arith.constant 0 : i32
    return %arg0, %c0_i32, %c0_i32_0 : i32, i32, i32
  }
  func.func @transform_1(%arg0: i32) -> (i32, i32) {
    %c0_i32 = arith.constant 0 : i32
    %c0_i32_0 = arith.constant 0 : i32
    %c0_i32_1 = arith.constant 0 : i32
    return %c0_i32, %c0_i32_0 : i32, i32
  }
  func.func @transform_2(%arg0: i32) -> (i32, i32, i32) {
    %c0_i32 = arith.constant 0 : i32
    %c0_i32_0 = arith.constant 0 : i32
    %c0_i32_1 = arith.constant 0 : i32
    return %arg0, %c0_i32, %c0_i32_0 : i32, i32, i32
  }
  func.func @transform_3(%arg0: i32) -> (i32, i32, i32) {
    %c0_i32 = arith.constant 0 : i32
    %c0_i32_0 = arith.constant 0 : i32
    %c0_i32_1 = arith.constant 0 : i32
    return %arg0, %c0_i32, %c0_i32_0 : i32, i32, i32
  }
}

module attributes {stable_mosaic.version = 11 : i64} {
  func.func @_bn_relu_conv2_kernel(%arg0: i32, %arg1: memref<1x8x256xbf16, #tpu.memory_space<vmem>>, %arg2: memref<8x1xf32, #tpu.memory_space<vmem>>, %arg3: memref<8x1xf32, #tpu.memory_space<vmem>>, %arg4: memref<8x80xbf16, #tpu.memory_space<vmem>>, %arg5: memref<1x8x256xbf16, #tpu.memory_space<vmem>>, %arg6: memref<1x8x128xf32, #tpu.memory_space<vmem>>) attributes {dimension_semantics = [#tpu.dimension_semantics<parallel>], iteration_bounds = array<i64: 2>, scalar_prefetch = 0 : i64, scratch_operands = 0 : i64, tpu.core_type = #tpu.core_type<tc>, window_params = [{transform_indices = @transform_0, window_bounds = array<i64: 1, 8, 256>}, {pipeline_mode = #tpu.pipeline_mode<synchronous>, transform_indices = @transform_1, window_bounds = array<i64: 8, 1>}, {pipeline_mode = #tpu.pipeline_mode<synchronous>, transform_indices = @transform_2, window_bounds = array<i64: 8, 1>}, {pipeline_mode = #tpu.pipeline_mode<synchronous>, transform_indices = @transform_3, window_bounds = array<i64: 8, 80>}, {transform_indices = @transform_4, window_bounds = array<i64: 1, 8, 256>}, {transform_indices = @transform_5, window_bounds = array<i64: 1, 8, 128>}]} {
    %c0 = arith.constant 0 : index
    %c0_0 = arith.constant 0 : index
    %c0_1 = arith.constant 0 : index
    %0 = vector.load %arg1[%c0, %c0_0, %c0_1] : memref<1x8x256xbf16, #tpu.memory_space<vmem>>, vector<1x8x256xbf16>
    %1 = vector.shape_cast %0 : vector<1x8x256xbf16> to vector<8x256xbf16>
    %2 = arith.extf %1 : vector<8x256xbf16> to vector<8x256xf32>
    %c0_2 = arith.constant 0 : index
    %c0_3 = arith.constant 0 : index
    %3 = vector.load %arg2[%c0_2, %c0_3] : memref<8x1xf32, #tpu.memory_space<vmem>>, vector<8x1xf32>
    %4 = vector.broadcast %3 : vector<8x1xf32> to vector<8x256xf32>
    %5 = arith.mulf %2, %4 : vector<8x256xf32>
    %c0_4 = arith.constant 0 : index
    %c0_5 = arith.constant 0 : index
    %6 = vector.load %arg3[%c0_4, %c0_5] : memref<8x1xf32, #tpu.memory_space<vmem>>, vector<8x1xf32>
    %7 = vector.broadcast %6 : vector<8x1xf32> to vector<8x256xf32>
    %8 = arith.addf %5, %7 : vector<8x256xf32>
    %cst = arith.constant 0.000000e+00 : f32
    %9 = vector.broadcast %cst : f32 to vector<8x256xf32>
    %10 = arith.maximumf %8, %9 : vector<8x256xf32>
    %c0_6 = arith.constant 0 : index
    %c0_7 = arith.constant 0 : index
    %11 = vector.load %arg4[%c0_6, %c0_7] : memref<8x80xbf16, #tpu.memory_space<vmem>>, vector<8x80xbf16>
    %12 = tpu.iota {dimensions = array<i32: 1>} : vector<8x256xi32>
    %c16_i32 = arith.constant 16 : i32
    %c0_i32 = arith.constant 0 : i32
    %13 = arith.cmpi eq, %c16_i32, %c0_i32 : i32
    %c1_i32 = arith.constant 1 : i32
    %14 = arith.select %13, %c1_i32, %c16_i32 : i32
    %15 = vector.broadcast %14 : i32 to vector<8x256xi32>
    %16 = arith.remsi %12, %15 : vector<8x256xi32>
    %c0_i32_8 = arith.constant 0 : i32
    %17 = vector.broadcast %c0_i32_8 : i32 to vector<8x256xi32>
    %18 = arith.cmpi ne, %16, %17 : vector<8x256xi32>
    %c0_i32_9 = arith.constant 0 : i32
    %19 = vector.broadcast %c0_i32_9 : i32 to vector<8x256xi32>
    %20 = arith.cmpi slt, %16, %19 : vector<8x256xi32>
    %c0_i32_10 = arith.constant 0 : i32
    %21 = arith.cmpi slt, %14, %c0_i32_10 : i32
    %22 = vector.broadcast %21 : i1 to vector<8x256xi1>
    %23 = vector.broadcast %22 : vector<8x256xi1> to vector<8x256xi1>
    %24 = arith.xori %20, %23 : vector<8x256xi1>
    %25 = arith.andi %24, %18 : vector<8x256xi1>
    %26 = vector.broadcast %14 : i32 to vector<8x256xi32>
    %27 = arith.addi %16, %26 : vector<8x256xi32>
    %28 = arith.select %25, %27, %16 : vector<8x256xi1>, vector<8x256xi32>
    %c34_i32 = arith.constant 34 : i32
    %29 = tpu.dynamic_rotate %10 by %c34_i32 dim 1 : vector<8x256xf32>, i32 -> vector<8x256xf32>
    %c32_i32 = arith.constant 32 : i32
    %30 = vector.broadcast %c32_i32 : i32 to vector<8x256xi32>
    %31 = arith.cmpi sge, %12, %30 : vector<8x256xi32>
    %c256_i32 = arith.constant 256 : i32
    %32 = vector.broadcast %c256_i32 : i32 to vector<8x256xi32>
    %33 = arith.cmpi slt, %12, %32 : vector<8x256xi32>
    %34 = arith.andi %31, %33 : vector<8x256xi1>
    %c2_i32 = arith.constant 2 : i32
    %35 = vector.broadcast %c2_i32 : i32 to vector<8x256xi32>
    %36 = arith.cmpi sge, %28, %35 : vector<8x256xi32>
    %37 = arith.andi %34, %36 : vector<8x256xi1>
    %c16_i32_11 = arith.constant 16 : i32
    %38 = vector.broadcast %c16_i32_11 : i32 to vector<8x256xi32>
    %39 = arith.cmpi slt, %28, %38 : vector<8x256xi32>
    %40 = arith.andi %37, %39 : vector<8x256xi1>
    %cst_12 = arith.constant 0.000000e+00 : f32
    %41 = vector.broadcast %cst_12 : f32 to vector<8x256xf32>
    %42 = arith.select %40, %29, %41 : vector<8x256xi1>, vector<8x256xf32>
    %43 = arith.truncf %42 : vector<8x256xf32> to vector<8x256xbf16>
    %c32_i32_13 = arith.constant 32 : i32
    %44 = tpu.dynamic_rotate %10 by %c32_i32_13 dim 1 : vector<8x256xf32>, i32 -> vector<8x256xf32>
    %c32_i32_14 = arith.constant 32 : i32
    %45 = vector.broadcast %c32_i32_14 : i32 to vector<8x256xi32>
    %46 = arith.cmpi sge, %12, %45 : vector<8x256xi32>
    %c256_i32_15 = arith.constant 256 : i32
    %47 = vector.broadcast %c256_i32_15 : i32 to vector<8x256xi32>
    %48 = arith.cmpi slt, %12, %47 : vector<8x256xi32>
    %49 = arith.andi %46, %48 : vector<8x256xi1>
    %c0_i32_16 = arith.constant 0 : i32
    %50 = vector.broadcast %c0_i32_16 : i32 to vector<8x256xi32>
    %51 = arith.cmpi sge, %28, %50 : vector<8x256xi32>
    %52 = arith.andi %49, %51 : vector<8x256xi1>
    %c16_i32_17 = arith.constant 16 : i32
    %53 = vector.broadcast %c16_i32_17 : i32 to vector<8x256xi32>
    %54 = arith.cmpi slt, %28, %53 : vector<8x256xi32>
    %55 = arith.andi %52, %54 : vector<8x256xi1>
    %cst_18 = arith.constant 0.000000e+00 : f32
    %56 = vector.broadcast %cst_18 : f32 to vector<8x256xf32>
    %57 = arith.select %55, %44, %56 : vector<8x256xi1>, vector<8x256xf32>
    %58 = arith.truncf %57 : vector<8x256xf32> to vector<8x256xbf16>
    %c30_i32 = arith.constant 30 : i32
    %59 = tpu.dynamic_rotate %10 by %c30_i32 dim 1 : vector<8x256xf32>, i32 -> vector<8x256xf32>
    %c32_i32_19 = arith.constant 32 : i32
    %60 = vector.broadcast %c32_i32_19 : i32 to vector<8x256xi32>
    %61 = arith.cmpi sge, %12, %60 : vector<8x256xi32>
    %c256_i32_20 = arith.constant 256 : i32
    %62 = vector.broadcast %c256_i32_20 : i32 to vector<8x256xi32>
    %63 = arith.cmpi slt, %12, %62 : vector<8x256xi32>
    %64 = arith.andi %61, %63 : vector<8x256xi1>
    %c0_i32_21 = arith.constant 0 : i32
    %65 = vector.broadcast %c0_i32_21 : i32 to vector<8x256xi32>
    %66 = arith.cmpi sge, %28, %65 : vector<8x256xi32>
    %67 = arith.andi %64, %66 : vector<8x256xi1>
    %c14_i32 = arith.constant 14 : i32
    %68 = vector.broadcast %c14_i32 : i32 to vector<8x256xi32>
    %69 = arith.cmpi slt, %28, %68 : vector<8x256xi32>
    %70 = arith.andi %67, %69 : vector<8x256xi1>
    %cst_22 = arith.constant 0.000000e+00 : f32
    %71 = vector.broadcast %cst_22 : f32 to vector<8x256xf32>
    %72 = arith.select %70, %59, %71 : vector<8x256xi1>, vector<8x256xf32>
    %73 = arith.truncf %72 : vector<8x256xf32> to vector<8x256xbf16>
    %c2_i32_23 = arith.constant 2 : i32
    %74 = tpu.dynamic_rotate %10 by %c2_i32_23 dim 1 : vector<8x256xf32>, i32 -> vector<8x256xf32>
    %c0_i32_24 = arith.constant 0 : i32
    %75 = vector.broadcast %c0_i32_24 : i32 to vector<8x256xi32>
    %76 = arith.cmpi sge, %12, %75 : vector<8x256xi32>
    %c256_i32_25 = arith.constant 256 : i32
    %77 = vector.broadcast %c256_i32_25 : i32 to vector<8x256xi32>
    %78 = arith.cmpi slt, %12, %77 : vector<8x256xi32>
    %79 = arith.andi %76, %78 : vector<8x256xi1>
    %c2_i32_26 = arith.constant 2 : i32
    %80 = vector.broadcast %c2_i32_26 : i32 to vector<8x256xi32>
    %81 = arith.cmpi sge, %28, %80 : vector<8x256xi32>
    %82 = arith.andi %79, %81 : vector<8x256xi1>
    %c16_i32_27 = arith.constant 16 : i32
    %83 = vector.broadcast %c16_i32_27 : i32 to vector<8x256xi32>
    %84 = arith.cmpi slt, %28, %83 : vector<8x256xi32>
    %85 = arith.andi %82, %84 : vector<8x256xi1>
    %cst_28 = arith.constant 0.000000e+00 : f32
    %86 = vector.broadcast %cst_28 : f32 to vector<8x256xf32>
    %87 = arith.select %85, %74, %86 : vector<8x256xi1>, vector<8x256xf32>
    %88 = arith.truncf %87 : vector<8x256xf32> to vector<8x256xbf16>
    %c0_i32_29 = arith.constant 0 : i32
    %89 = vector.broadcast %c0_i32_29 : i32 to vector<8x256xi32>
    %90 = arith.cmpi sge, %12, %89 : vector<8x256xi32>
    %c256_i32_30 = arith.constant 256 : i32
    %91 = vector.broadcast %c256_i32_30 : i32 to vector<8x256xi32>
    %92 = arith.cmpi slt, %12, %91 : vector<8x256xi32>
    %93 = arith.andi %90, %92 : vector<8x256xi1>
    %c0_i32_31 = arith.constant 0 : i32
    %94 = vector.broadcast %c0_i32_31 : i32 to vector<8x256xi32>
    %95 = arith.cmpi sge, %28, %94 : vector<8x256xi32>
    %96 = arith.andi %93, %95 : vector<8x256xi1>
    %c16_i32_32 = arith.constant 16 : i32
    %97 = vector.broadcast %c16_i32_32 : i32 to vector<8x256xi32>
    %98 = arith.cmpi slt, %28, %97 : vector<8x256xi32>
    %99 = arith.andi %96, %98 : vector<8x256xi1>
    %cst_33 = arith.constant 0.000000e+00 : f32
    %100 = vector.broadcast %cst_33 : f32 to vector<8x256xf32>
    %101 = arith.select %99, %10, %100 : vector<8x256xi1>, vector<8x256xf32>
    %102 = arith.truncf %101 : vector<8x256xf32> to vector<8x256xbf16>
    %c254_i32 = arith.constant 254 : i32
    %103 = tpu.dynamic_rotate %10 by %c254_i32 dim 1 : vector<8x256xf32>, i32 -> vector<8x256xf32>
    %c0_i32_34 = arith.constant 0 : i32
    %104 = vector.broadcast %c0_i32_34 : i32 to vector<8x256xi32>
    %105 = arith.cmpi sge, %12, %104 : vector<8x256xi32>
    %c256_i32_35 = arith.constant 256 : i32
    %106 = vector.broadcast %c256_i32_35 : i32 to vector<8x256xi32>
    %107 = arith.cmpi slt, %12, %106 : vector<8x256xi32>
    %108 = arith.andi %105, %107 : vector<8x256xi1>
    %c0_i32_36 = arith.constant 0 : i32
    %109 = vector.broadcast %c0_i32_36 : i32 to vector<8x256xi32>
    %110 = arith.cmpi sge, %28, %109 : vector<8x256xi32>
    %111 = arith.andi %108, %110 : vector<8x256xi1>
    %c14_i32_37 = arith.constant 14 : i32
    %112 = vector.broadcast %c14_i32_37 : i32 to vector<8x256xi32>
    %113 = arith.cmpi slt, %28, %112 : vector<8x256xi32>
    %114 = arith.andi %111, %113 : vector<8x256xi1>
    %cst_38 = arith.constant 0.000000e+00 : f32
    %115 = vector.broadcast %cst_38 : f32 to vector<8x256xf32>
    %116 = arith.select %114, %103, %115 : vector<8x256xi1>, vector<8x256xf32>
    %117 = arith.truncf %116 : vector<8x256xf32> to vector<8x256xbf16>
    %c226_i32 = arith.constant 226 : i32
    %118 = tpu.dynamic_rotate %10 by %c226_i32 dim 1 : vector<8x256xf32>, i32 -> vector<8x256xf32>
    %c0_i32_39 = arith.constant 0 : i32
    %119 = vector.broadcast %c0_i32_39 : i32 to vector<8x256xi32>
    %120 = arith.cmpi sge, %12, %119 : vector<8x256xi32>
    %c224_i32 = arith.constant 224 : i32
    %121 = vector.broadcast %c224_i32 : i32 to vector<8x256xi32>
    %122 = arith.cmpi slt, %12, %121 : vector<8x256xi32>
    %123 = arith.andi %120, %122 : vector<8x256xi1>
    %c2_i32_40 = arith.constant 2 : i32
    %124 = vector.broadcast %c2_i32_40 : i32 to vector<8x256xi32>
    %125 = arith.cmpi sge, %28, %124 : vector<8x256xi32>
    %126 = arith.andi %123, %125 : vector<8x256xi1>
    %c16_i32_41 = arith.constant 16 : i32
    %127 = vector.broadcast %c16_i32_41 : i32 to vector<8x256xi32>
    %128 = arith.cmpi slt, %28, %127 : vector<8x256xi32>
    %129 = arith.andi %126, %128 : vector<8x256xi1>
    %cst_42 = arith.constant 0.000000e+00 : f32
    %130 = vector.broadcast %cst_42 : f32 to vector<8x256xf32>
    %131 = arith.select %129, %118, %130 : vector<8x256xi1>, vector<8x256xf32>
    %132 = arith.truncf %131 : vector<8x256xf32> to vector<8x256xbf16>
    %c224_i32_43 = arith.constant 224 : i32
    %133 = tpu.dynamic_rotate %10 by %c224_i32_43 dim 1 : vector<8x256xf32>, i32 -> vector<8x256xf32>
    %c0_i32_44 = arith.constant 0 : i32
    %134 = vector.broadcast %c0_i32_44 : i32 to vector<8x256xi32>
    %135 = arith.cmpi sge, %12, %134 : vector<8x256xi32>
    %c224_i32_45 = arith.constant 224 : i32
    %136 = vector.broadcast %c224_i32_45 : i32 to vector<8x256xi32>
    %137 = arith.cmpi slt, %12, %136 : vector<8x256xi32>
    %138 = arith.andi %135, %137 : vector<8x256xi1>
    %c0_i32_46 = arith.constant 0 : i32
    %139 = vector.broadcast %c0_i32_46 : i32 to vector<8x256xi32>
    %140 = arith.cmpi sge, %28, %139 : vector<8x256xi32>
    %141 = arith.andi %138, %140 : vector<8x256xi1>
    %c16_i32_47 = arith.constant 16 : i32
    %142 = vector.broadcast %c16_i32_47 : i32 to vector<8x256xi32>
    %143 = arith.cmpi slt, %28, %142 : vector<8x256xi32>
    %144 = arith.andi %141, %143 : vector<8x256xi1>
    %cst_48 = arith.constant 0.000000e+00 : f32
    %145 = vector.broadcast %cst_48 : f32 to vector<8x256xf32>
    %146 = arith.select %144, %133, %145 : vector<8x256xi1>, vector<8x256xf32>
    %147 = arith.truncf %146 : vector<8x256xf32> to vector<8x256xbf16>
    %c222_i32 = arith.constant 222 : i32
    %148 = tpu.dynamic_rotate %10 by %c222_i32 dim 1 : vector<8x256xf32>, i32 -> vector<8x256xf32>
    %c0_i32_49 = arith.constant 0 : i32
    %149 = vector.broadcast %c0_i32_49 : i32 to vector<8x256xi32>
    %150 = arith.cmpi sge, %12, %149 : vector<8x256xi32>
    %c224_i32_50 = arith.constant 224 : i32
    %151 = vector.broadcast %c224_i32_50 : i32 to vector<8x256xi32>
    %152 = arith.cmpi slt, %12, %151 : vector<8x256xi32>
    %153 = arith.andi %150, %152 : vector<8x256xi1>
    %c0_i32_51 = arith.constant 0 : i32
    %154 = vector.broadcast %c0_i32_51 : i32 to vector<8x256xi32>
    %155 = arith.cmpi sge, %28, %154 : vector<8x256xi32>
    %156 = arith.andi %153, %155 : vector<8x256xi1>
    %c14_i32_52 = arith.constant 14 : i32
    %157 = vector.broadcast %c14_i32_52 : i32 to vector<8x256xi32>
    %158 = arith.cmpi slt, %28, %157 : vector<8x256xi32>
    %159 = arith.andi %156, %158 : vector<8x256xi1>
    %cst_53 = arith.constant 0.000000e+00 : f32
    %160 = vector.broadcast %cst_53 : f32 to vector<8x256xf32>
    %161 = arith.select %159, %148, %160 : vector<8x256xi1>, vector<8x256xf32>
    %162 = arith.truncf %161 : vector<8x256xf32> to vector<8x256xbf16>
    %cst_54 = arith.constant 0.000000e+00 : bf16
    %163 = vector.broadcast %cst_54 : bf16 to vector<8x256xbf16>
    %164 = tpu.concatenate %43, %58, %73, %88, %102, %117, %132, %147, %162, %163 in 0 : vector<8x256xbf16>, vector<8x256xbf16>, vector<8x256xbf16>, vector<8x256xbf16>, vector<8x256xbf16>, vector<8x256xbf16>, vector<8x256xbf16>, vector<8x256xbf16>, vector<8x256xbf16>, vector<8x256xbf16> -> vector<80x256xbf16>
    %cst_55 = arith.constant dense<0.000000e+00> : vector<8x256xf32>
    %165 = tpu.matmul %11, %164, %cst_55 {dimension_numbers = #tpu.dot_dimension_numbers<[1], [0], [0], [1], [0, 0, 1, 1], [], []>} : vector<8x80xbf16>, vector<80x256xbf16>, vector<8x256xf32> -> vector<8x256xf32>
    %166 = arith.truncf %165 : vector<8x256xf32> to vector<8x256xbf16>
    %c0_56 = arith.constant 0 : index
    %c0_57 = arith.constant 0 : index
    %c0_58 = arith.constant 0 : index
    %167 = vector.load %arg5[%c0_56, %c0_57, %c0_58] : memref<1x8x256xbf16, #tpu.memory_space<vmem>>, vector<1x8x256xbf16>
    %168 = vector.shape_cast %167 : vector<1x8x256xbf16> to vector<8x256xbf16>
    %169 = vector.shape_cast %166 : vector<8x256xbf16> to vector<1x8x256xbf16>
    tpu.vector_store %arg5[%c0_56, %c0_57, %c0_58], %169 {strides = array<i32>} : memref<1x8x256xbf16, #tpu.memory_space<vmem>>, vector<1x8x256xbf16>,
    %cst_59 = arith.constant dense<0.000000e+00> : vector<8xf32>
    %170 = vector.multi_reduction <add>, %165, %cst_59 [1] : vector<8x256xf32> to vector<8xf32>
    %171 = vector.shape_cast %170 : vector<8xf32> to vector<8x1xf32>
    %172 = arith.mulf %165, %165 : vector<8x256xf32>
    %cst_60 = arith.constant dense<0.000000e+00> : vector<8xf32>
    %173 = vector.multi_reduction <add>, %172, %cst_60 [1] : vector<8x256xf32> to vector<8xf32>
    %174 = vector.shape_cast %173 : vector<8xf32> to vector<8x1xf32>
    %175 = tpu.iota {dimensions = array<i32: 1>} : vector<8x128xi32>
    %c0_i32_61 = arith.constant 0 : i32
    %176 = vector.broadcast %c0_i32_61 : i32 to vector<8x128xi32>
    %177 = arith.cmpi eq, %175, %176 : vector<8x128xi32>
    %c1_i32_62 = arith.constant 1 : i32
    %178 = vector.broadcast %c1_i32_62 : i32 to vector<8x128xi32>
    %179 = arith.cmpi eq, %175, %178 : vector<8x128xi32>
    %cst_63 = arith.constant 0.000000e+00 : f32
    %180 = vector.shape_cast %174 : vector<8x1xf32> to vector<8x1xf32>
    %181 = vector.broadcast %180 : vector<8x1xf32> to vector<8x128xf32>
    %182 = vector.broadcast %cst_63 : f32 to vector<8x128xf32>
    %183 = arith.select %179, %181, %182 : vector<8x128xi1>, vector<8x128xf32>
    %184 = vector.shape_cast %171 : vector<8x1xf32> to vector<8x1xf32>
    %185 = vector.broadcast %184 : vector<8x1xf32> to vector<8x128xf32>
    %186 = arith.select %177, %185, %183 : vector<8x128xi1>, vector<8x128xf32>
    %c0_64 = arith.constant 0 : index
    %c0_65 = arith.constant 0 : index
    %c0_66 = arith.constant 0 : index
    %187 = vector.load %arg6[%c0_64, %c0_65, %c0_66] : memref<1x8x128xf32, #tpu.memory_space<vmem>>, vector<1x8x128xf32>
    %188 = vector.shape_cast %187 : vector<1x8x128xf32> to vector<8x128xf32>
    %189 = vector.shape_cast %186 : vector<8x128xf32> to vector<1x8x128xf32>
    tpu.vector_store %arg6[%c0_64, %c0_65, %c0_66], %189 {strides = array<i32>} : memref<1x8x128xf32, #tpu.memory_space<vmem>>, vector<1x8x128xf32>,
    return
  }
  func.func @transform_0(%arg0: i32) -> (i32, i32, i32) {
    %c0_i32 = arith.constant 0 : i32
    %c0_i32_0 = arith.constant 0 : i32
    %c0_i32_1 = arith.constant 0 : i32
    return %arg0, %c0_i32, %c0_i32_0 : i32, i32, i32
  }
  func.func @transform_1(%arg0: i32) -> (i32, i32) {
    %c0_i32 = arith.constant 0 : i32
    %c0_i32_0 = arith.constant 0 : i32
    %c0_i32_1 = arith.constant 0 : i32
    return %c0_i32, %c0_i32_0 : i32, i32
  }
  func.func @transform_2(%arg0: i32) -> (i32, i32) {
    %c0_i32 = arith.constant 0 : i32
    %c0_i32_0 = arith.constant 0 : i32
    %c0_i32_1 = arith.constant 0 : i32
    return %c0_i32, %c0_i32_0 : i32, i32
  }
  func.func @transform_3(%arg0: i32) -> (i32, i32) {
    %c0_i32 = arith.constant 0 : i32
    %c0_i32_0 = arith.constant 0 : i32
    %c0_i32_1 = arith.constant 0 : i32
    return %c0_i32, %c0_i32_0 : i32, i32
  }
  func.func @transform_4(%arg0: i32) -> (i32, i32, i32) {
    %c0_i32 = arith.constant 0 : i32
    %c0_i32_0 = arith.constant 0 : i32
    %c0_i32_1 = arith.constant 0 : i32
    return %arg0, %c0_i32, %c0_i32_0 : i32, i32, i32
  }
  func.func @transform_5(%arg0: i32) -> (i32, i32, i32) {
    %c0_i32 = arith.constant 0 : i32
    %c0_i32_0 = arith.constant 0 : i32
    %c0_i32_1 = arith.constant 0 : i32
    return %arg0, %c0_i32, %c0_i32_0 : i32, i32, i32
  }
}

</mosaic_0001>

<bundles_post_ra>
// kernel: double_conv.2
= control target key start
LH: loop header
LB: loop body
LE: loop exit
PB: predicated region body
PF: predicated region fallthrough
CT: control target
= control target key end

     0   :  { %s727_s12 = smov 0   ;;  %s892_s0 = inlined_call_operand.vmem [shape: f32[2,4,256], index: 0, kind: input, shape index: {}]   ;;  %s893_s1 = inlined_call_operand.vmem [shape: bf16[8,48], index: 1, kind: input, shape index: {}]   ;;  %s894_s2 = inlined_call_operand.vmem [shape: bf16[2,8,256], index: 2, kind: output, shape index: {0}]   ;;  %s895_s3 = inlined_call_operand.vmem [shape: f32[2,8,128], index: 3, kind: output, shape index: {1}]  }
   0x1 LB: > { %s619_s13 = sadd.s32 4294967295, %s697_s12   ;;  %p623_p0 = scmp.ge.s32.totalorder %s697_s12, 1  ;;  %s697_s12 = sphi %s727_s12, %s14_s12  }
   0x2   : > { %p140_p1 = scmp.lt.s32.totalorder %s697_s12, 3 }
   0x4   : > { %p141_p2 = pnand %p623_p0, %p140_p1 }
   0x5   : > { %p168_p3 = scmp.lt.s32.totalorder (!%p141_p2), %s619_s13, 1  ;;  %s699_s18 = smov (!%p141_p2), 126  }
   0x6   : > { %144 = sbr.rel (%p141_p2) target bundleno = 477 (0x1dd), region = 28  ;;  %s700_s19 = smov (!%p141_p2), 32  }
   0x7   : > { %s701_s20 = smov (!%p141_p2), 98   ;;  %s702_s21 = smov (!%p141_p2), 34  }
   0x8   : > { %s703_s22 = smov (!%p141_p2), 96   ;;  %s704_s23 = smov (!%p141_p2), 94  }
   0x9   : > { %s705_s24 = smov (!%p141_p2), 30   ;;  %s706_s25 = smov (!%p141_p2), 2  }
   0xb   : > { %s913_s13 = smov (!%p168_p3, %s619_s13), 1  ;;  %v185_v27 = vlaneseq  ;;  %vm446_vm15 = vcmask 1041408  }
   0xc   : > { %s735_s14 = sshll.u32 %s913_s13, 3 }
   0xd   : > { %s172_s17 = scalar_lea.vmem %s892_s0, %s735_s14  ;;  %v745_v28 = vand.u32 127, %v185_v27  ;;  %s177_s30 = scalar_lea.vmem %s894_s2, %s735_s14 }
   0xe   : > { %v183_v0 = vld [vmem:[%s172_s17] sm:$0xff]  ;;  %s181_s6 = scalar_lea.vmem %s895_s3, %s735_s14 }
   0xf   : > { %213 = vst [vmem:[#allocation1] ss:$2 sm:$0xff] %v183_v0  ;;  %v748_v29 = vadd.s32 128, %v745_v28  ;;  %v192_v32 = vand.u32 15, %v745_v28  ;;  %vm326_vm0 = vcmp.lt.s32.totalorder %v745_v28, 126  ;;  %vm251_vm1 = vcmp.lt.s32.totalorder %v745_v28, 32 }
  0x10   : > { %vm225_vm4 = vcmp.ge.s32.totalorder %v745_v28, 32  ;;  %vm343_vm6 = vcmp.lt.s32.totalorder %v745_v28, 98  ;;  %vm366_vm9 = vcmp.lt.s32.totalorder %v745_v28, 96  ;;  %vm222_vm10 = vcmp.lt.s32.totalorder %v745_v28, 34 }
  0x11   : > { %v199_v33 = vand.u32 15, %v748_v29  ;;  %vm754_vm2 = vcmp.lt.s32.totalorder %v192_v32, 14  ;;  %vm347_vm7 = vcmp.lt.s32.totalorder %v748_v29, 224  ;;  %vm777_vm8 = vcmp.ge.s32.totalorder %v192_v32, 2 }
  0x12   : > { %vm795_vm12 = vmand %vm225_vm4, %vm777_vm8  ;;  %vm272_vm13 = vcmp.lt.s32.totalorder %v745_v28, 30  ;;  %vm385_vm14 = vcmp.lt.s32.totalorder %v745_v28, 94 }
  0x13   : > { %vm758_vm3 = vcmp.lt.s32.totalorder %v199_v33, 14  ;;  %vm769_vm5 = vcmp.ge.s32.totalorder %v199_v33, 2 }
  0x14   : > { %vm787_vm11 = vmand %vm347_vm7, %vm769_vm5 }
  0x16   : > { %v214_v1 = vld.sshfl [vmem:[#allocation1] sm:$0xff pattern:$0x75316420]  ;;  %v215_v2 = vld.sshfl [vmem:[#allocation1 + $0x8] sm:$0xff pattern:$0x75316420] }
  0x17   : > { %242 = vst [vmem:[#allocation1] ss:$2 sm:$0xff] %v183_v0  ;;  %v656_v18 = vpack.i.bf16 %v215_v2, %v214_v1 }
  0x1e   : > { %v243_v3 = vld.sshfl [vmem:[#allocation1] sm:$0xff pattern:$0x75316420]  ;;  %v244_v4 = vld.sshfl [vmem:[#allocation1 + $0x8] sm:$0xff pattern:$0x75316420] }
  0x1f   : > { %263 = vst [vmem:[#allocation1] ss:$2 sm:$0xff] %v183_v0  ;;  %v651_v14 = vpack.i.bf16 %v244_v4, %v243_v3 }
  0x21   : > { %652 = vrot.lane.b32.xlu2 %v651_v14, %s700_s19 }
  0x26   : > { %v264_v5 = vld.sshfl [vmem:[#allocation1] sm:$0xff pattern:$0x75316420]  ;;  %v265_v6 = vld.sshfl [vmem:[#allocation1 + $0x8] sm:$0xff pattern:$0x75316420] }
  0x27   : > { %282 = vst [vmem:[#allocation1] ss:$2 sm:$0xff] %v183_v0  ;;  %v686_v22 = vpack.i.bf16 %v265_v6, %v264_v5 }
  0x29   : > { %657 = vrot.lane.b32.xlu2 %v656_v18, %s702_s21 }
  0x2e   : > { %v283_v7 = vld.sshfl [vmem:[#allocation1] sm:$0xff pattern:$0x75316420]  ;;  %v284_v8 = vld.sshfl [vmem:[#allocation1 + $0x8] sm:$0xff pattern:$0x75316420] }
  0x2f   : > { %309 = vst [vmem:[#allocation1] ss:$2 sm:$0xff] %v183_v0  ;;  %v681_v26 = vpack.i.bf16 %v284_v8, %v283_v7 }
  0x36   : > { %v741_v9 = vld.sshfl [vmem:[#allocation1] sm:$0xff pattern:$0x75316420]  ;;  %v743_v10 = vld.sshfl [vmem:[#allocation1 + $0x8] sm:$0xff pattern:$0x75316420] }
  0x37   : > { %317 = vst [vmem:[#allocation1] ss:$2 sm:$0xff] %v183_v0  ;;  %v316_v53 = vpack.c.bf16 %v743_v10, %v741_v9 }
  0x39   : > { %v418_v2 = vunpack.c.l.b16 %v316_v53  ;;  %v419_v7 = vunpack.c.h.b16 %v316_v53 }
  0x3e   : > { %v318_v11 = vld.sshfl [vmem:[#allocation1] sm:$0xff pattern:$0x75316420]  ;;  %v319_v12 = vld.sshfl [vmem:[#allocation1 + $0x8] sm:$0xff pattern:$0x75316420] }
  0x3f   : > { %334 = vst [vmem:[#allocation1] ss:$2 sm:$0xff] %v183_v0  ;;  %v661_v13 = vpack.i.bf16 %v319_v12, %v318_v11 }
  0x41   : > { %662 = vrot.lane.b32.xlu0 %v661_v13, %s699_s18 }
  0x46   : > { %v335_v15 = vld.sshfl [vmem:[#allocation1] sm:$0xff pattern:$0x75316420]  ;;  %v336_v16 = vld.sshfl [vmem:[#allocation1 + $0x8] sm:$0xff pattern:$0x75316420] }
  0x47   : > { %v666_v17 = vpack.i.bf16 %v336_v16, %v335_v15  ;;  %357 = vst [vmem:[#allocation1] ss:$2 sm:$0xff] %v183_v0 }
  0x49   : > { %667 = vrot.lane.b32.xlu1 %v666_v17, %s701_s20 }
  0x4e   : > { %v358_v19 = vld.sshfl [vmem:[#allocation1] sm:$0xff pattern:$0x75316420]  ;;  %v359_v20 = vld.sshfl [vmem:[#allocation1 + $0x8] sm:$0xff pattern:$0x75316420] }
  0x4f   : > { %v671_v21 = vpack.i.bf16 %v359_v20, %v358_v19  ;;  %376 = vst [vmem:[#allocation1] ss:$2 sm:$0xff] %v183_v0 }
  0x51   : > { %672 = vrot.lane.b32.xlu1 %v671_v21, %s703_s22  ;;  %v420_v21 = vpack.c.b16 %v418_v2, %v418_v2 }
  0x56   : > { %v377_v23 = vld.sshfl [vmem:[#allocation1] sm:$0xff pattern:$0x75316420]  ;;  %v378_v24 = vld.sshfl [vmem:[#allocation1 + $0x8] sm:$0xff pattern:$0x75316420] }
  0x57   : > { %v676_v25 = vpack.i.bf16 %v378_v24, %v377_v23 }
  0x59   : > { %677 = vrot.lane.b32.xlu0 %v676_v25, %s704_s23  ;;  %687 = vrot.lane.b32.xlu1 %v686_v22, %s705_s24  ;;  %v421_v22 = vpack.c.b16 %v419_v7, %v419_v7 }
  0x61   : > { %682 = vrot.lane.b32.xlu0 %v681_v26, %s706_s25 }
  0x7b   : > { %v653_v31 = vpop.permute.xlu2 %652 }
  0x7c   : > { %v655_v36 = vunpack.i.h.bf16 %v653_v31  ;;  %v654_v37 = vunpack.i.l.bf16 %v653_v31 }
  0x7e   : > { %v253_v43 = vsel %vm251_vm1, %v655_v36, %v654_v37  ;;  %v252_v46 = vsel %vm251_vm1, %v654_v37, %v655_v36  ;;  %vm831_vm1 = vmand %vm225_vm4, %vm754_vm2  ;;  %v184_v36 = vld [vmem:[%s893_s1] sm:$0xf] }
  0x7f   : > { %v260_v47 = vsel %vm225_vm4, %v253_v43, 0.0  ;;  %vm291_vm4 = vcmp.lt.s32.totalorder %v745_v28, 2 }
  0x80   : > { %v262_v54 = vpack.c.bf16 %v252_v46, %v260_v47 }
  0x82   : > { %v399_v3 = vunpack.c.l.b16 %v262_v54  ;;  %v400_v13 = vunpack.c.h.b16 %v262_v54 }
  0x83   : > { %v658_v48 = vpop.permute.xlu2 %657 }
  0x84   : > { %v660_v55 = vunpack.i.h.bf16 %v658_v48  ;;  %v659_v56 = vunpack.i.l.bf16 %v658_v48  ;;  %v815_v20 = vpack.c.b16 %v399_v3, %v399_v3  ;;  %v817_v23 = vpack.c.b16 %v400_v13, %v400_v13 }
  0x86   : > { %v223_v5 = vsel %vm222_vm10, %v659_v56, %v660_v55  ;;  %v224_v6 = vsel %vm222_vm10, %v660_v55, %v659_v56 }
  0x87   : > { %v239_v16 = vsel %vm795_vm12, %v224_v6, 0.0  ;;  %v240_v17 = vsel %vm769_vm5, %v223_v5, 0.0 }
  0x88   : > { %v241_v25 = vpack.c.bf16 %v240_v17, %v239_v16  ;;  %v403_v17 = vrot.slane %v815_v20, 6 }
  0x8a   : > { %v394_v48 = vunpack.c.l.b16 %v241_v25 }
  0xb3   : > { %v663_v30 = vpop.permute.xlu0 %662 }
  0xb4   : > { %v665_v34 = vunpack.i.h.bf16 %v663_v30  ;;  %v664_v35 = vunpack.i.l.bf16 %v663_v30 }
  0xb6   : > { %v327_v40 = vsel %vm326_vm0, %v664_v35, %v665_v34  ;;  %v328_v41 = vsel %vm326_vm0, %v665_v34, %v664_v35  ;;  %vm823_vm0 = vmand %vm347_vm7, %vm758_vm3 }
  0xb7   : > { %v331_v44 = vsel %vm754_vm2, %v327_v40, 0.0  ;;  %v332_v45 = vsel %vm758_vm3, %v328_v41, 0.0 }
  0xb8   : > { %v333_v51 = vpack.c.bf16 %v332_v45, %v331_v44 }
  0xba   : > { %v423_v61 = vunpack.c.l.b16 %v333_v51  ;;  %v424_v62 = vunpack.c.h.b16 %v333_v51 }
  0xbb   : > { %v668_v42 = vpop.permute.xlu1 %667 }
  0xbc   : > { %v670_v49 = vunpack.i.h.bf16 %v668_v42  ;;  %v669_v50 = vunpack.i.l.bf16 %v668_v42  ;;  %v425_v14 = vpack.c.b16 %v423_v61, %v423_v61  ;;  %v426_v15 = vpack.c.b16 %v424_v62, %v424_v62 }
  0xbe   : > { %v344_v59 = vsel %vm343_vm6, %v669_v50, %v670_v49  ;;  %v345_v60 = vsel %vm343_vm6, %v670_v49, %v669_v50  ;;  %v427_v27 = vrot.slane %v425_v14, 6  ;;  %v428_v30 = vrot.slane %v426_v15, 6 }
  0xbf   : > { %v354_v8 = vsel %vm777_vm8, %v344_v59, 0.0  ;;  %v355_v9 = vsel %vm787_vm11, %v345_v60, 0.0  ;;  %vm453_vm6 = vcmask 1043456  }
  0xc0   : > { %v356_v18 = vpack.c.bf16 %v355_v9, %v354_v8  ;;  %v467_v38 = vsel %vm446_vm15, %v420_v21, %v427_v27  ;;  %v470_v60 = vsel %vm446_vm15, %v421_v22, %v428_v30 }
  0xc2   : > { %v430_v37 = vunpack.c.l.b16 %v356_v18  ;;  %v431_v41 = vunpack.c.h.b16 %v356_v18 }
  0xc3   : > { %v673_v63 = vpop.permute.xlu1 %672 }
  0xc4   : > { %v675_v0 = vunpack.i.h.bf16 %v673_v63  ;;  %v674_v1 = vunpack.i.l.bf16 %v673_v63  ;;  %v432_v53 = vpack.c.b16 %v430_v37, %v430_v37  ;;  %v433_v55 = vpack.c.b16 %v431_v41, %v431_v41 }
  0xc5   : > { %v396_v63 = vpack.c.b16 %v394_v48, %v394_v48 }
  0xc6   : > { %v367_v10 = vsel %vm366_vm9, %v674_v1, %v675_v0  ;;  %v368_v11 = vsel %vm366_vm9, %v675_v0, %v674_v1  ;;  %v395_v0 = vunpack.c.h.b16 %v241_v25  ;;  %v472_v5 = vsel %vm453_vm6, %v467_v38, %v432_v53 }
  0xc7   : > { %v374_v12 = vsel %vm347_vm7, %v368_v11, 0.0  ;;  %v474_v7 = vsel %vm453_vm6, %v470_v60, %v433_v55  ;;  %v449_v27 = vsel %vm446_vm15, %v396_v63, %v403_v17  ;;  %vm528_vm7 = vcmp.eq.s32.totalorder %v745_v28, 0 }
  0xc8   : > { %v375_v19 = vpack.c.bf16 %v374_v12, %v367_v10  ;;  %v397_v18 = vpack.c.b16 %v395_v0, %v395_v0 }
  0xca   : > { %v435_v40 = vunpack.c.l.b16 %v375_v19  ;;  %v436_v42 = vunpack.c.h.b16 %v375_v19  ;;  %v404_v19 = vrot.slane %v817_v23, 6 }
  0xcb   : > { %v678_v24 = vpop.permute.xlu0 %677  ;;  %v688_v26 = vpop.permute.xlu1 %687 }
  0xcc   : > { %v680_v31 = vunpack.i.h.bf16 %v678_v24  ;;  %v679_v32 = vunpack.i.l.bf16 %v678_v24  ;;  %v690_v33 = vunpack.i.h.bf16 %v688_v26  ;;  %v689_v34 = vunpack.i.l.bf16 %v688_v26 }
  0xcd   : > { %v437_v54 = vpack.c.b16 %v435_v40, %v435_v40  ;;  %v438_v56 = vpack.c.b16 %v436_v42, %v436_v42  ;;  %v452_v20 = vsel %vm446_vm15, %v397_v18, %v404_v19 }
  0xce   : > { %v273_v43 = vsel %vm272_vm13, %v689_v34, %v690_v33  ;;  %v274_v29 = vsel %vm272_vm13, %v690_v33, %v689_v34  ;;  %v386_v44 = vsel %vm385_vm14, %v679_v32, %v680_v31  ;;  %v387_v45 = vsel %vm385_vm14, %v680_v31, %v679_v32 }
  0xcf   : > { %v390_v46 = vsel %vm754_vm2, %v386_v44, 0.0  ;;  %v391_v47 = vsel %vm823_vm0, %v387_v45, 0.0  ;;  %v279_v49 = vsel %vm831_vm1, %v274_v29, 0.0  ;;  %v280_v50 = vsel %vm758_vm3, %v273_v43, 0.0 }
  0xd0   : > { %v392_v51 = vpack.c.bf16 %v391_v47, %v390_v46  ;;  %v281_v61 = vpack.c.bf16 %v280_v50, %v279_v49  ;;  %vm458_vm2 = vcmask 1045504   ;;  %v439_v4 = vrot.slane %v437_v54, 2 }
  0xd1   : > { %v440_v6 = vrot.slane %v438_v56, 2  ;;  %vm488_vm3 = vcmask 392192  }
  0xd2   : > { %v442_v58 = vunpack.c.l.b16 %v392_v51  ;;  %v443_v59 = vunpack.c.h.b16 %v392_v51  ;;  %v406_v14 = vunpack.c.l.b16 %v281_v61  ;;  %v407_v15 = vunpack.c.h.b16 %v281_v61 }
  0xd3   : > { %v683_v62 = vpop.permute.xlu0 %682  ;;  %v476_v21 = vsel %vm458_vm2, %v472_v5, %v439_v4  ;;  %v479_v22 = vsel %vm458_vm2, %v474_v7, %v440_v6 }
  0xd4   : > { %v685_v1 = vunpack.i.h.bf16 %v683_v62  ;;  %v684_v39 = vunpack.i.l.bf16 %v683_v62  ;;  %v444_v2 = vpack.c.b16 %v442_v58, %v442_v58  ;;  %v445_v3 = vpack.c.b16 %v443_v59, %v443_v59 }
  0xd5   : > { %v408_v52 = vpack.c.b16 %v406_v14, %v406_v14  ;;  %v409_v25 = vpack.c.b16 %v407_v15, %v407_v15 }
  0xd6   : > { %v292_v8 = vsel %vm291_vm4, %v684_v39, %v685_v1  ;;  %v293_v9 = vsel %vm291_vm4, %v685_v1, %v684_v39  ;;  %v483_v10 = vsel %vm446_vm15, %v444_v2, 0  ;;  %v486_v11 = vsel %vm446_vm15, %v445_v3, 0 }
  0xd7   : > { %v302_v12 = vsel %vm777_vm8, %v293_v9, 0.0  ;;  %v303_v13 = vsel %vm769_vm5, %v292_v8, 0.0  ;;  %497 = vmatpush.bf16.msra.mxu0 %v483_v10  ;;  %510 = vmatpush.bf16.msra.mxu1 %v486_v11  ;;  %v455_v23 = vsel %vm453_vm6, %v449_v27, %v408_v52  ;;  %v457_v33 = vsel %vm453_vm6, %v452_v20, %v409_v25 }
  0xd8   : > { %v304_v16 = vpack.c.bf16 %v303_v13, %v302_v12  ;;  %vm529_vm5 = vcmp.eq.s32.totalorder %v745_v28, 1 }
  0xda   : > { %v411_v24 = vunpack.c.l.b16 %v304_v16  ;;  %v412_v57 = vunpack.c.h.b16 %v304_v16 }
  0xdb   : > { %498 = vmatpush.bf16.msra.mxu0 %v476_v21  ;;  %511 = vmatpush.bf16.msra.mxu1 %v479_v22 }
  0xdc   : > { %v413_v26 = vpack.c.b16 %v411_v24, %v411_v24  ;;  %v414_v30 = vpack.c.b16 %v412_v57, %v412_v57 }
  0xde   : > { %v415_v31 = vrot.slane %v413_v26, 2  ;;  %v416_v32 = vrot.slane %v414_v30, 2 }
  0xe0   : > { %v460_v34 = vsel %vm458_vm2, %v455_v23, %v415_v31  ;;  %v463_v35 = vsel %vm458_vm2, %v457_v33, %v416_v32 }
  0xe1   : > { %499 = vmatpush.bf16.msra.mxu0 %v460_v34  ;;  %512 = vmatpush.bf16.msra.mxu1 %v463_v35 }
  0xe4   : > { %629 = vmatmul.msk.bf16.vlgmr.msra.gmra.mxu0 %vm488_vm3, %v184_v36  ;;  %630 = vmatmul.msk.bf16.vlgmr.msra.gmra.mxu1 %vm488_vm3, %v184_v36 }
 0x161   : > { %v501_v37 = vpop.f32.mrf.mxu0  ;;  %v514_v40 = vpop.f32.mrf.mxu1 }
 0x162   : > { %v518_v41 = vpack.c.bf16 %v514_v40, %v501_v37  ;;  %v520_v42 = vadd.f32 %v514_v40, %v501_v37  ;;  %v523_v43 = vmul.f32 %v501_v37, %v501_v37  ;;  %v524_v29 = vmul.f32 %v514_v40, %v514_v40 }
 0x164   : > { %519 = vst [vmem:[%s177_s30] sm:$0xff] %v518_v41  ;;  %521 = vadd.xlane.f32.xlu0 %v520_v42  ;;  %v525_v44 = vadd.f32 %v524_v29, %v523_v43 }
 0x166   : > { %526 = vadd.xlane.f32.xlu2 %v525_v44 }
 0x169   : > { %v503_v45 = vpop.f32.mrf.mxu0  ;;  %v516_v46 = vpop.f32.mrf.mxu1 }
 0x1d7   : > { %v522_v48 = vpop.xlane.xlu0 %521 }
 0x1d9   : > { %v527_v47 = vpop.xlane.xlu2 %526 }
 0x1da   : > { %v530_v49 = vsel %vm529_vm5, %v527_v47, 0.0 }
 0x1db   : > { %v531_v50 = vsel %vm528_vm7, %v522_v48, %v530_v49 }
 0x1dc   : > { %532 = vst [vmem:[%s181_s6] sm:$0xff] %v531_v50 }
 0x1dd PF: > { %s14_s12 = sadd.s32 1, %s697_s12  }
 0x1de   : > { %p11_p4 = scmp.ge.s32.totalorder %s14_s12, 4  }
 0x1e0   :  { %13 = sbr.rel (!%p11_p4) target bundleno = 1 (0x1), region = 70 }

// kernel: double_conv.3
= control target key start
LH: loop header
LB: loop body
LE: loop exit
PB: predicated region body
PF: predicated region fallthrough
CT: control target
= control target key end

     0   :  { %s758_s18 = smov 0   ;;  %s916_s0 = inlined_call_operand.vmem [shape: bf16[2,8,256], index: 0, kind: input, shape index: {}]   ;;  %s917_s1 = inlined_call_operand.vmem [shape: f32[8,1], index: 1, kind: input, shape index: {}]   ;;  %s918_s2 = inlined_call_operand.vmem [shape: f32[8,1], index: 2, kind: input, shape index: {}]   ;;  %s919_s3 = inlined_call_operand.vmem [shape: bf16[8,80], index: 3, kind: input, shape index: {}]   ;;  %s920_s4 = inlined_call_operand.vmem [shape: bf16[2,8,256], index: 4, kind: output, shape index: {0}]   ;;  %s921_s5 = inlined_call_operand.vmem [shape: f32[2,8,128], index: 5, kind: output, shape index: {1}]  }
   0x1 LB: > { %s637_s19 = sadd.s32 4294967295, %s717_s18   ;;  %p641_p0 = scmp.ge.s32.totalorder %s717_s18, 1  ;;  %s717_s18 = sphi %s758_s18, %s16_s18  }
   0x2   : > { %p190_p1 = scmp.lt.s32.totalorder %s717_s18, 3 }
   0x4   : > { %p191_p2 = pnand %p641_p0, %p190_p1 }
   0x5   : > { %p222_p3 = scmp.lt.s32.totalorder (!%p191_p2), %s637_s19, 1  ;;  %s720_s28 = smov (!%p191_p2), 30  }
   0x6   : > { %194 = sbr.rel (%p191_p2) target bundleno = 541 (0x21d), region = 36  ;;  %s721_s29 = smov (!%p191_p2), 96  }
   0x7   : > { %s722_s30 = smov (!%p191_p2), 94   ;;  %s723_s6 = smov (!%p191_p2), 32  }
   0x8   : > { %s724_s7 = smov (!%p191_p2), 126   ;;  %s725_s8 = smov (!%p191_p2), 98  }
   0x9   : > { %s726_s9 = smov (!%p191_p2), 34   ;;  %s727_s10 = smov (!%p191_p2), 2  }
   0xb   : > { %v240_v0 = vld [vmem:[%s917_s1] sm:$0xff]  ;;  %v719_v1 = vmov 0   ;;  %s939_s19 = smov (!%p222_p3, %s637_s19), 1  ;;  %v259_v17 = vlaneseq  ;;  %vm466_vm13 = vcmask 1043456  }
   0xc   : > { %670 = vset.pattern.permute.xlu0 %v719_v1  ;;  %v248_v2 = vld [vmem:[%s918_s2] sm:$0xff]  ;;  %s772_s24 = sshll.u32 %s939_s19, 3 }
   0xd   : > { %243 = vperm.xlu0 %670, %v240_v0   ;;  %s226_s27 = scalar_lea.vmem %s916_s0, %s772_s24  ;;  %v780_v18 = vand.u32 127, %v259_v17  ;;  %s231_s15 = scalar_lea.vmem %s920_s4, %s772_s24 }
   0xe   : > { %v237_v4 = vld [vmem:[%s226_s27] sm:$0xff]  ;;  %s235_s19 = scalar_lea.vmem %s921_s5, %s772_s24 }
   0xf   : > { %v238_v5 = vunpack.c.l.bf16 %v237_v4  ;;  %v239_v6 = vunpack.c.h.bf16 %v237_v4  ;;  %v261_v19 = vadd.s32 128, %v780_v18  ;;  %vm399_vm0 = vcmp.lt.s32.totalorder %v780_v18, 96 }
  0x10   : > { %v266_v25 = vand.u32 15, %v780_v18  ;;  %vm369_vm3 = vcmp.lt.s32.totalorder %v780_v18, 126  ;;  %vm413_vm4 = vcmp.lt.s32.totalorder %v780_v18, 94  ;;  %vm290_vm7 = vcmp.lt.s32.totalorder %v780_v18, 34 }
  0x11   : > { %v273_v23 = vand.u32 15, %v261_v19  ;;  %vm385_vm1 = vcmp.lt.s32.totalorder %v261_v19, 224  ;;  %vm293_vm8 = vcmp.ge.s32.totalorder %v780_v18, 32  ;;  %vm330_vm11 = vcmp.lt.s32.totalorder %v780_v18, 30 }
  0x12   : > { %vm801_vm6 = vcmp.lt.s32.totalorder %v266_v25, 14  ;;  %vm807_vm9 = vcmp.ge.s32.totalorder %v266_v25, 2  ;;  %vm314_vm12 = vcmp.lt.s32.totalorder %v780_v18, 32  ;;  %vm381_vm14 = vcmp.lt.s32.totalorder %v780_v18, 98 }
  0x13   : > { %vm786_vm2 = vcmp.lt.s32.totalorder %v273_v23, 14  ;;  %vm811_vm10 = vcmp.ge.s32.totalorder %v273_v23, 2 }
  0x14   : > { %vm797_vm5 = vmand %vm385_vm1, %vm786_vm2 }
  0x15   : > { %251 = vperm.xlu0 %670, %v248_v2   ;;  %vm829_vm15 = vmand %vm385_vm1, %vm811_vm10 }
  0x7f   : > { %v244_v3 = vpop.permute.xlu0 %243 }
  0x80   : > { %v246_v7 = vmul.f32 %v244_v3, %v238_v5  ;;  %v247_v8 = vmul.f32 %v244_v3, %v239_v6 }
  0x87   : > { %v252_v9 = vpop.permute.xlu0 %251 }
  0x88   : > { %v254_v10 = vadd.f32 %v252_v9, %v246_v7  ;;  %v255_v11 = vadd.f32 %v252_v9, %v247_v8 }
  0x8a   : > { %v256_v12 = vmax.f32 %v254_v10, 0.0  ;;  %v257_v13 = vmax.f32 %v255_v11, 0.0 }
  0x8c   : > { %v691_v14 = vpack.i.bf16 %v257_v13, %v256_v12  ;;  %v778_v15 = vpack.c.bf16 %v257_v13, %v256_v12 }
  0x8e   : > { %692 = vrot.lane.b32.xlu0 %v691_v14, %s720_s28  ;;  %682 = vrot.lane.b32.xlu2 %v691_v14, %s721_s29  ;;  %v442_v29 = vunpack.c.l.b16 %v778_v15  ;;  %v443_v32 = vunpack.c.h.b16 %v778_v15 }
  0x8f   : > { %672 = vrot.lane.b32.xlu1 %v691_v14, %s722_s30 }
  0x96   : > { %707 = vrot.lane.b32.xlu0 %v691_v14, %s723_s6  ;;  %687 = vrot.lane.b32.xlu2 %v691_v14, %s724_s7 }
  0x97   : > { %677 = vrot.lane.b32.xlu1 %v691_v14, %s725_s8 }
  0x9e   : > { %702 = vrot.lane.b32.xlu2 %v691_v14, %s726_s9 }
  0x9f   : > { %697 = vrot.lane.b32.xlu1 %v691_v14, %s727_s10 }
  0xe8   : > { %v683_v16 = vpop.permute.xlu2 %682 }
  0xe9   : > { %v685_v20 = vunpack.i.h.bf16 %v683_v16  ;;  %v684_v21 = vunpack.i.l.bf16 %v683_v16 }
  0xeb   : > { %v401_v24 = vsel %vm399_vm0, %v685_v20, %v684_v21  ;;  %v400_v33 = vsel %vm399_vm0, %v684_v21, %v685_v20  ;;  %vm837_vm0 = vmand %vm293_vm8, %vm801_vm6 }
  0xec   : > { %v407_v34 = vsel %vm385_vm1, %v401_v24, 0.0  ;;  %vm859_vm1 = vmand %vm293_vm8, %vm807_vm9 }
  0xed   : > { %v408_v44 = vpack.c.bf16 %v407_v34, %v400_v33 }
  0xef   : > { %v457_v62 = vunpack.c.l.b16 %v408_v44  ;;  %v458_v7 = vunpack.c.h.b16 %v408_v44  ;;  %v444_v44 = vpack.c.b16 %v442_v29, %v442_v29  ;;  %v445_v29 = vpack.c.b16 %v443_v32, %v443_v32 }
  0xf0   : > { %v688_v22 = vpop.permute.xlu2 %687 }
  0xf1   : > { %v690_v26 = vunpack.i.h.bf16 %v688_v22  ;;  %v689_v27 = vunpack.i.l.bf16 %v688_v22  ;;  %v459_v24 = vpack.c.b16 %v457_v62, %v457_v62 }
  0xf3   : > { %v370_v40 = vsel %vm369_vm3, %v689_v27, %v690_v26  ;;  %v371_v41 = vsel %vm369_vm3, %v690_v26, %v689_v27  ;;  %vm344_vm3 = vcmp.lt.s32.totalorder %v780_v18, 2 }
  0xf4   : > { %v374_v50 = vsel %vm801_vm6, %v370_v40, 0.0  ;;  %v375_v51 = vsel %vm786_vm2, %v371_v41, 0.0 }
  0xf5   : > { %v376_v8 = vpack.c.bf16 %v375_v51, %v374_v50 }
  0xf7   : > { %v447_v25 = vunpack.c.l.b16 %v376_v8  ;;  %v448_v26 = vunpack.c.h.b16 %v376_v8 }
  0xf8   : > { %v703_v46 = vpop.permute.xlu2 %702 }
  0xf9   : > { %v705_v54 = vunpack.i.h.bf16 %v703_v46  ;;  %v704_v55 = vunpack.i.l.bf16 %v703_v46  ;;  %v449_v46 = vpack.c.b16 %v447_v25, %v447_v25 }
  0xfb   : > { %v291_v9 = vsel %vm290_vm7, %v704_v55, %v705_v54  ;;  %v292_v20 = vsel %vm290_vm7, %v705_v54, %v704_v55 }
  0xfc   : > { %v307_v34 = vsel %vm859_vm1, %v292_v20, 0.0  ;;  %v308_v30 = vsel %vm811_vm10, %v291_v9, 0.0 }
  0xfd   : > { %v309_v54 = vpack.c.bf16 %v308_v30, %v307_v34 }
  0xff   : > { %v422_v45 = vunpack.c.l.b16 %v309_v54  ;;  %v423_v63 = vunpack.c.h.b16 %v309_v54 }
 0x100   : > { %v693_v28 = vpop.permute.xlu0 %692 }
 0x101   : > { %v673_v31 = vpop.permute.xlu1 %672  ;;  %v695_v52 = vunpack.i.h.bf16 %v693_v28  ;;  %v694_v53 = vunpack.i.l.bf16 %v693_v28 }
 0x102   : > { %v675_v35 = vunpack.i.h.bf16 %v673_v31  ;;  %v674_v36 = vunpack.i.l.bf16 %v673_v31 }
 0x103   : > { %v331_v5 = vsel %vm330_vm11, %v694_v53, %v695_v52  ;;  %v332_v6 = vsel %vm330_vm11, %v695_v52, %v694_v53 }
 0x104   : > { %v414_v42 = vsel %vm413_vm4, %v674_v36, %v675_v35  ;;  %v415_v43 = vsel %vm413_vm4, %v675_v35, %v674_v36  ;;  %v337_v21 = vsel %vm837_vm0, %v332_v6, 0.0  ;;  %v338_v22 = vsel %vm786_vm2, %v331_v5, 0.0 }
 0x105   : > { %v418_v47 = vsel %vm801_vm6, %v414_v42, 0.0  ;;  %v419_v48 = vsel %vm797_vm5, %v415_v43, 0.0  ;;  %v460_v36 = vpack.c.b16 %v458_v7, %v458_v7  ;;  %v339_v37 = vpack.c.bf16 %v338_v22, %v337_v21 }
 0x106   : > { %v420_v49 = vpack.c.bf16 %v419_v48, %v418_v47  ;;  %v450_v47 = vpack.c.b16 %v448_v26, %v448_v26  ;;  %v424_v6 = vpack.c.b16 %v422_v45, %v422_v45  ;;  %v425_v7 = vpack.c.b16 %v423_v63, %v423_v63 }
 0x107   : > { %vm506_vm2 = vcmask 654336   ;;  %vm547_vm4 = vcmp.eq.s32.totalorder %v780_v18, 1  ;;  %vm546_vm5 = vcmp.eq.s32.totalorder %v780_v18, 0 }
 0x108   : > { %v708_v56 = vpop.permute.xlu0 %707  ;;  %v462_v57 = vunpack.c.l.b16 %v420_v49  ;;  %v463_v58 = vunpack.c.h.b16 %v420_v49 }
 0x109   : > { %v710_v59 = vunpack.i.h.bf16 %v708_v56  ;;  %v709_v60 = vunpack.i.l.bf16 %v708_v56  ;;  %v678_v61 = vpop.permute.xlu1 %677  ;;  %v432_v56 = vunpack.c.l.b16 %v339_v37 }
 0x10a   : > { %v680_v0 = vunpack.i.h.bf16 %v678_v61  ;;  %v679_v1 = vunpack.i.l.bf16 %v678_v61  ;;  %v464_v2 = vpack.c.b16 %v462_v57, %v462_v57  ;;  %v465_v3 = vpack.c.b16 %v463_v58, %v463_v58 }
 0x10b   : > { %v316_v13 = vsel %vm314_vm12, %v710_v59, %v709_v60  ;;  %v315_v27 = vsel %vm314_vm12, %v709_v60, %v710_v59  ;;  %v433_v57 = vunpack.c.h.b16 %v339_v37  ;;  %v485_v58 = vsel %vm466_vm13, %v444_v44, %v449_v46 }
 0x10c   : > { %v382_v10 = vsel %vm381_vm14, %v679_v1, %v680_v0  ;;  %v383_v11 = vsel %vm381_vm14, %v680_v0, %v679_v1  ;;  %v501_v12 = vsel %vm466_vm13, %v464_v2, 0  ;;  %v504_v17 = vsel %vm466_vm13, %v465_v3, 0 }
 0x10d   : > { %v392_v14 = vsel %vm807_vm9, %v382_v10, 0.0  ;;  %v393_v16 = vsel %vm829_vm15, %v383_v11, 0.0  ;;  %513 = vmatpush.bf16.msra.mxu0 %v501_v12  ;;  %526 = vmatpush.bf16.msra.mxu1 %v504_v17  ;;  %v323_v28 = vsel %vm293_vm8, %v316_v13, 0.0  ;;  %v489_v59 = vsel %vm466_vm13, %v445_v29, %v450_v47  ;;  %v258_v10 = vld [vmem:[%s919_s3] sm:$0xf] }
 0x10e   : > { %v394_v23 = vpack.c.bf16 %v393_v16, %v392_v14  ;;  %v325_v43 = vpack.c.bf16 %v315_v27, %v323_v28  ;;  %v434_v0 = vpack.c.b16 %v432_v56, %v432_v56  ;;  %v435_v1 = vpack.c.b16 %v433_v57, %v433_v57 }
 0x110   : > { %v452_v31 = vunpack.c.l.b16 %v394_v23  ;;  %v453_v33 = vunpack.c.h.b16 %v394_v23  ;;  %v427_v61 = vunpack.c.l.b16 %v325_v43  ;;  %v428_v62 = vunpack.c.h.b16 %v325_v43 }
 0x111   : > { %v698_v35 = vpop.permute.xlu1 %697 }
 0x112   : > { %v700_v38 = vunpack.i.h.bf16 %v698_v35  ;;  %v699_v40 = vunpack.i.l.bf16 %v698_v35  ;;  %v454_v41 = vpack.c.b16 %v452_v31, %v452_v31  ;;  %v455_v42 = vpack.c.b16 %v453_v33, %v453_v33 }
 0x113   : > { %v429_v4 = vpack.c.b16 %v427_v61, %v427_v61  ;;  %v430_v5 = vpack.c.b16 %v428_v62, %v428_v62 }
 0x114   : > { %v345_v48 = vsel %vm344_vm3, %v699_v40, %v700_v38  ;;  %v346_v49 = vsel %vm344_vm3, %v700_v38, %v699_v40  ;;  %v493_v50 = vsel %vm466_vm13, %v454_v41, %v459_v24  ;;  %v497_v51 = vsel %vm466_vm13, %v455_v42, %v460_v36 }
 0x115   : > { %v355_v52 = vsel %vm807_vm9, %v346_v49, 0.0  ;;  %v356_v53 = vsel %vm811_vm10, %v345_v48, 0.0  ;;  %514 = vmatpush.bf16.msra.mxu0 %v493_v50  ;;  %527 = vmatpush.bf16.msra.mxu1 %v497_v51  ;;  %v469_v8 = vsel %vm466_vm13, %v424_v6, %v429_v4  ;;  %v473_v9 = vsel %vm466_vm13, %v425_v7, %v430_v5 }
 0x116   : > { %v357_v55 = vpack.c.bf16 %v356_v53, %v355_v52 }
 0x118   : > { %v437_v60 = vunpack.c.l.b16 %v357_v55  ;;  %v438_v39 = vunpack.c.h.b16 %v357_v55 }
 0x119   : > { %515 = vmatpush.bf16.msra.mxu0 %v485_v58  ;;  %528 = vmatpush.bf16.msra.mxu1 %v489_v59 }
 0x11a   : > { %v439_v15 = vpack.c.b16 %v437_v60, %v437_v60  ;;  %v440_v32 = vpack.c.b16 %v438_v39, %v438_v39 }
 0x11c   : > { %v477_v2 = vsel %vm466_vm13, %v434_v0, %v439_v15  ;;  %v481_v3 = vsel %vm466_vm13, %v435_v1, %v440_v32 }
 0x11d   : > { %516 = vmatpush.bf16.msra.mxu0 %v477_v2  ;;  %529 = vmatpush.bf16.msra.mxu1 %v481_v3 }
 0x121   : > { %517 = vmatpush.bf16.msra.mxu0 %v469_v8  ;;  %530 = vmatpush.bf16.msra.mxu1 %v473_v9 }
 0x124   : > { %647 = vmatmul.msk.bf16.vlgmr.msra.gmra.mxu0 %vm506_vm2, %v258_v10  ;;  %648 = vmatmul.msk.bf16.vlgmr.msra.gmra.mxu1 %vm506_vm2, %v258_v10 }
 0x1a1   : > { %v519_v11 = vpop.f32.mrf.mxu0  ;;  %v532_v12 = vpop.f32.mrf.mxu1 }
 0x1a2   : > { %v536_v13 = vpack.c.bf16 %v532_v12, %v519_v11  ;;  %v538_v14 = vadd.f32 %v532_v12, %v519_v11  ;;  %v541_v16 = vmul.f32 %v519_v11, %v519_v11  ;;  %v542_v17 = vmul.f32 %v532_v12, %v532_v12 }
 0x1a4   : > { %537 = vst [vmem:[%s231_s15] sm:$0xff] %v536_v13  ;;  %539 = vadd.xlane.f32.xlu2 %v538_v14  ;;  %v543_v19 = vadd.f32 %v542_v17, %v541_v16 }
 0x1a6   : > { %544 = vadd.xlane.f32.xlu1 %v543_v19 }
 0x1a9   : > { %v521_v20 = vpop.f32.mrf.mxu0  ;;  %v534_v21 = vpop.f32.mrf.mxu1 }
 0x217   : > { %v540_v23 = vpop.xlane.xlu2 %539 }
 0x219   : > { %v545_v22 = vpop.xlane.xlu1 %544 }
 0x21a   : > { %v548_v24 = vsel %vm547_vm4, %v545_v22, 0.0 }
 0x21b   : > { %v549_v25 = vsel %vm546_vm5, %v540_v23, %v548_v24 }
 0x21c   : > { %550 = vst [vmem:[%s235_s19] sm:$0xff] %v549_v25 }
 0x21d PF: > { %s16_s18 = sadd.s32 1, %s717_s18  }
 0x21e   : > { %p13_p4 = scmp.ge.s32.totalorder %s16_s18, 4  }
 0x220   :  { %15 = sbr.rel (!%p13_p4) target bundleno = 1 (0x1), region = 78 }

</bundles_post_ra>
